<compile_context>
chip_gen: v7x
topology: tpu7x:2x2x1
jax: 0.10.0
libtpu: 0.0.40
codegen_flags: <defaults>
</compile_context>

<pallas_src>
import functools

import jax
import jax.numpy as jnp
from jax import lax
from jax.experimental import pallas as pl
from jax.experimental.pallas import tpu as pltpu


_EXPLORATION_N_ITER = 250   # sklearn's early-exaggeration phase length
_STATE_ROWS = 8             # one sublane tile: transposed state (8, N) = 1 vreg

# dot_general dims: contract axis 0 of both operands, out[i,j] = sum_r a[r,i]*b[r,j]
_TN_DIMS = (((0,), (0,)), ((), ()))


# ----------------------------------------------------------------------------
# Kernel 1: pairwise squared euclidean distances  D_ij = ||x_i - x_j||^2
# (one-off setup; single block is fine at N=128, D=32)
# ----------------------------------------------------------------------------
def _sqdist_kernel(x_ref, d_ref):
    x = x_ref[...]                                                # (N, D)
    sq = jnp.sum(x * x, axis=1, keepdims=True)                    # (N, 1)
    gram = jnp.dot(x, x.T, preferred_element_type=jnp.float32)    # (N, N) on MXU
    d = sq + sq.T - 2.0 * gram
    d_ref[...] = jnp.maximum(d, 0.0)


def pairwise_sqdist(x):
    # TODO(synk): for N beyond ~2k, tile as grid=(N/tm, N/tn) with "parallel"
    # axes (and bf16 operands on v6e/v7x) so the (N,N) output is not resident.
    n, d = x.shape
    return pl.pallas_call(
        _sqdist_kernel,
        out_shape=jax.ShapeDtypeStruct((n, n), jnp.float32),
        grid=(1,),
        in_specs=[pl.BlockSpec((n, d), lambda i: (0, 0))],
        out_specs=pl.BlockSpec((n, n), lambda i: (0, 0)),
    )(x)


# ----------------------------------------------------------------------------
# Kernel 2: fully fused t-SNE gradient descent.
#
#   Transposed state yt (8, N): rows [0, C) = embedding components, row C = 1
#   (constant), rows (C, 8) = 0.  The padding rows receive an exactly-zero
#   gradient, so they stay fixed for the whole run.
#
#   One K=8 MXU call gives (1 + ||y_i - y_j||^2) directly:
#     a = yt with row C+1 := sq (sq = sum_r yt_r^2 = ||y_i||^2 + 1)
#     b = -2*yt with row C := sq - 1, row C+1 := 1
#     a^T b = 1 + sq_i + sq_j - 2*gram_ij        (the ones-row terms cancel)
#
#   W = (P' - Q) * num is symmetric, so a single yt @ W gives both (W @ Y)^T
#   (component rows) and rowsum(W) (the ones row), and
#     grad^T = 4 * (rowsum(W) * yt - yt @ W)     (4 folded into the lr)
# ----------------------------------------------------------------------------
def _tsne_fused_kernel(p_ref, y0_ref, out_ref, pscaled_ref, *,
                       n, n_phase1, n_phase2, early_exaggeration,
                       learning_rate, ones_row):
    lr4 = jnp.float32(4.0 * learning_rate)        # gradient's 4x folded in

    # one-time: early-exaggerated copy of P (no per-iteration (N,N) rescale)
    pscaled_ref[...] = p_ref[...] * jnp.float32(early_exaggeration)

    # row-index mask used to splice sq / ones rows into the matmul operands
    row_ids = lax.broadcasted_iota(jnp.int32, y0_ref.shape, 0)     # (8, N)

    def make_step(p_mat_ref, momentum):
        mom = jnp.float32(momentum)

        def step(_, carry):
            yt, vel, gains = carry                                 # each (8, N)

            # ---- (1 + pairwise squared distance) via ONE K=8 MXU call ----
            sq = jnp.sum(yt * yt, axis=0, keepdims=True)           # (1, N) = ||y_i||^2 + 1
            a = jnp.where(row_ids == ones_row + 1, sq, yt)
            b = jnp.where(row_ids == ones_row, sq - 1.0,
                          jnp.where(row_ids == ones_row + 1, 1.0, -2.0 * yt))
            one_plus_dist = jnp.maximum(
                lax.dot_general(a, b, _TN_DIMS,
                                preferred_element_type=jnp.float32), 1.0)

            # student-t numerator on the EUP slot; the diagonal (= 1) is kept —
            # it cancels exactly in the gradient, only the normalizer needs the
            # "- n" correction.  (Q's tiny 1e-12 clamp dropped: Q > 0 always.)
            num = pl.reciprocal(one_plus_dist, approx=True)        # (N, N)
            s = jnp.maximum(jnp.sum(num) - jnp.float32(n), 1e-6)
            w = (p_mat_ref[...] - num * (1.0 / s)) * num           # (N, N), symmetric

            # one (8,N)@(N,N) matmul: component rows = (W @ Y)^T, ones row =
            # rowsum(W) (W symmetric), so no separate (N,N) row reduction.
            wyt = jnp.dot(yt, w, preferred_element_type=jnp.float32)   # (8, N)
            rowsum = wyt[ones_row:ones_row + 1, :]                     # (1, N)
            grad = rowsum * yt - wyt            # true grad is 4x this (see lr4)

            # sklearn-style gains + momentum update on single-vreg state;
            # padding rows have grad == 0 exactly, so they stay fixed.
            same_sign = (grad > 0.0) == (vel > 0.0)
            gains = jnp.maximum(
                jnp.where(same_sign, gains * 0.8, gains + 0.2), 0.01)
            vel = mom * vel - lr4 * gains * grad
            return yt + vel, vel, gains
            # TODO(synk): no per-iteration mean-centering of Y (sklearn's
            # _gradient_descent doesn't recenter either); cosmetic drift only.

        return step

    yt0 = y0_ref[...]
    carry = (yt0, jnp.zeros_like(yt0), jnp.ones_like(yt0))
    # phase 1: early exaggeration (scaled P, momentum 0.5)
    carry = lax.fori_loop(0, n_phase1, make_step(pscaled_ref, 0.5), carry)
    # phase 2: final optimization (original P, momentum 0.8)
    carry = lax.fori_loop(0, n_phase2, make_step(p_ref, 0.8), carry)

    out_ref[...] = carry[0]


def _tsne_gd_loop(p, y0t, *, n_components, n_iter, exploration,
                  early_exaggeration, learning_rate):
    # TODO(synk): for N beyond ~2k (v7x: 64 MiB VMEM), restructure into a
    # row-tiled two-pass kernel (pass 1: S = sum(num); pass 2: gradient per
    # (tm, N) slab, optionally split across the 2 v7x TensorCores) and store P
    # in bf16 instead of this monolithic (N,N)-resident design.
    n = p.shape[0]
    rows = y0t.shape[0]
    n_phase1 = min(exploration, n_iter)
    n_phase2 = max(n_iter - exploration, 0)
    kernel = functools.partial(
        _tsne_fused_kernel, n=n, n_phase1=n_phase1, n_phase2=n_phase2,
        early_exaggeration=early_exaggeration, learning_rate=learning_rate,
        ones_row=n_components)
    return pl.pallas_call(
        kernel,
        out_shape=jax.ShapeDtypeStruct((rows, n), jnp.float32),
        grid_spec=pltpu.PrefetchScalarGridSpec(
            num_scalar_prefetch=0,
            grid=(1,),
            in_specs=[
                pl.BlockSpec((n, n), lambda i: (0, 0)),      # P (resident)
                pl.BlockSpec((rows, n), lambda i: (0, 0)),   # y0 transposed
            ],
            out_specs=pl.BlockSpec((rows, n), lambda i: (0, 0)),
            scratch_shapes=[
                pltpu.VMEM((n, n), jnp.float32),   # early-exaggerated P copy
            ]),
        compiler_params=pltpu.CompilerParams(
            dimension_semantics=("arbitrary",)),
    )(p, y0t)


# ----------------------------------------------------------------------------
# P-matrix from perplexity (per-row binary search on beta) — plain JAX glue.
# One-time setup; amortized over the full GD loop.
# ----------------------------------------------------------------------------
def _compute_p(dist, perplexity):
    n = dist.shape[0]
    target = jnp.log(jnp.float32(perplexity))
    mask = 1.0 - jnp.eye(n, dtype=jnp.float32)

    def row_p(d_row, m_row):
        def hfun(beta):
            p = jnp.exp(-d_row * beta) * m_row
            sp = jnp.maximum(jnp.sum(p), 1e-12)
            h = jnp.log(sp) + beta * jnp.sum(d_row * p) / sp
            return h, p / sp

        def body(_, carry):
            beta, bmin, bmax = carry
            h, _ = hfun(beta)
            too_high = h > target                 # entropy too high -> increase beta
            bmin = jnp.where(too_high, beta, bmin)
            bmax = jnp.where(too_high, bmax, beta)
            beta_up = jnp.where(jnp.isinf(bmax), beta * 2.0, (beta + bmax) * 0.5)
            beta_dn = jnp.where(jnp.isinf(bmin), beta * 0.5, (beta + bmin) * 0.5)
            beta = jnp.where(too_high, beta_up, beta_dn)
            return beta, bmin, bmax

        init = (jnp.float32(1.0), jnp.float32(-jnp.inf), jnp.float32(jnp.inf))
        beta, _, _ = lax.fori_loop(0, 50, body, init)
        _, p = hfun(beta)
        return p

    p_cond = jax.vmap(row_p)(dist, mask)
    p = (p_cond + p_cond.T) / (2.0 * n)
    return jnp.maximum(p, 1e-12)


# ----------------------------------------------------------------------------
# Full fit_transform (exact t-SNE, random init, gains + momentum like sklearn)
# ----------------------------------------------------------------------------
@functools.partial(
    jax.jit,
    static_argnames=("n_components", "perplexity", "early_exaggeration",
                     "learning_rate", "n_iter", "seed"))
def tsne_fit_transform(x, *, n_components=2, perplexity=30.0,
                       early_exaggeration=12.0, learning_rate=200.0,
                       n_iter=1000, seed=0):
    n = x.shape[0]
    # need rows [0,C) for components, row C for the constant ones row, and one
    # spare row (C+1) spliced per-iteration for the distance matmul trick.
    assert n_components <= _STATE_ROWS - 2

    dist = pairwise_sqdist(x)                      # Pallas kernel (setup)
    p = _compute_p(dist, perplexity)

    key = jax.random.PRNGKey(seed)
    y_small = 1e-4 * jax.random.normal(key, (n, n_components), dtype=jnp.float32)
    # transposed, sublane-padded state: (8, N) — one vreg per state array.
    y0t = jnp.zeros((_STATE_ROWS, n), jnp.float32)
    y0t = y0t.at[:n_components, :].set(y_small.T)
    y0t = y0t.at[n_components, :].set(1.0)         # constant ones row (rowsum trick)

    yt = _tsne_gd_loop(                            # Pallas kernel (fused hot loop)
        p, y0t, n_components=n_components, n_iter=n_iter,
        exploration=_EXPLORATION_N_ITER,
        early_exaggeration=float(early_exaggeration),
        learning_rate=float(learning_rate))
    return yt[:n_components, :].T
    # TODO(synk): sklearn's barnes_hut tree approximation, PCA init option and
    # KL-based early stopping (n_iter_without_progress / min_grad_norm) are
    # host-side / data-dependent control flow and are not ported.


if __name__ == "__main__":
    N, D = 128, 32                                 # small synthetic "self.data"
    key = jax.random.PRNGKey(0)
    x = jax.random.normal(key, (N, D), dtype=jnp.float32)

    y = tsne_fit_transform(
        x, n_components=2, perplexity=30.0, early_exaggeration=12.0,
        learning_rate=200.0, n_iter=1000, seed=0)
    y = jax.block_until_ready(y)

    assert y.shape == (N, 2)
    assert bool(jnp.all(jnp.isfinite(y)))
    print("KERNEL_OK")
</pallas_src>

<mosaic_0001>
module attributes {stable_mosaic.version = 11 : i64} {
  func.func @_sqdist_kernel(%arg0: i32, %arg1: memref<128x32xf32, #tpu.memory_space<vmem>>, %arg2: memref<128x128xf32, #tpu.memory_space<vmem>>) attributes {dimension_semantics = [#tpu.dimension_semantics<arbitrary>], iteration_bounds = array<i64: 1>, scalar_prefetch = 0 : i64, scratch_operands = 0 : i64, tpu.core_type = #tpu.core_type<tc>, window_params = [{pipeline_mode = #tpu.pipeline_mode<synchronous>, transform_indices = @transform_0, window_bounds = array<i64: 128, 32>}, {pipeline_mode = #tpu.pipeline_mode<synchronous>, transform_indices = @transform_1, window_bounds = array<i64: 128, 128>}]} {
    %c0 = arith.constant 0 : index
    %c0_0 = arith.constant 0 : index
    %0 = vector.load %arg1[%c0, %c0_0] : memref<128x32xf32, #tpu.memory_space<vmem>>, vector<128x32xf32>
    %1 = arith.mulf %0, %0 : vector<128x32xf32>
    %cst = arith.constant dense<0.000000e+00> : vector<128xf32>
    %2 = vector.multi_reduction <add>, %1, %cst [1] : vector<128x32xf32> to vector<128xf32>
    %3 = vector.shape_cast %2 : vector<128xf32> to vector<128x1xf32>
    %4 = tpu.transpose %0, [1, 0] : vector<128x32xf32> -> vector<32x128xf32>
    %cst_1 = arith.constant dense<0.000000e+00> : vector<128x128xf32>
    %5 = tpu.matmul %0, %4, %cst_1 {dimension_numbers = #tpu.dot_dimension_numbers<[1], [0], [0], [1], [0, 0, 1, 1], [], []>} : vector<128x32xf32>, vector<32x128xf32>, vector<128x128xf32> -> vector<128x128xf32>
    %6 = tpu.transpose %3, [1, 0] : vector<128x1xf32> -> vector<1x128xf32>
    %7 = vector.broadcast %3 : vector<128x1xf32> to vector<128x128xf32>
    %8 = vector.broadcast %6 : vector<1x128xf32> to vector<128x128xf32>
    %9 = arith.addf %7, %8 : vector<128x128xf32>
    %cst_2 = arith.constant 2.000000e+00 : f32
    %10 = vector.broadcast %cst_2 : f32 to vector<128x128xf32>
    %11 = arith.mulf %10, %5 : vector<128x128xf32>
    %12 = arith.subf %9, %11 : vector<128x128xf32>
    %cst_3 = arith.constant 0.000000e+00 : f32
    %13 = vector.broadcast %cst_3 : f32 to vector<128x128xf32>
    %14 = arith.maximumf %12, %13 : vector<128x128xf32>
    %c0_4 = arith.constant 0 : index
    %c0_5 = arith.constant 0 : index
    %15 = vector.load %arg2[%c0_4, %c0_5] : memref<128x128xf32, #tpu.memory_space<vmem>>, vector<128x128xf32>
    tpu.vector_store %arg2[%c0_4, %c0_5], %14 {strides = array<i32>} : memref<128x128xf32, #tpu.memory_space<vmem>>, vector<128x128xf32>,
    return
  }
  func.func @transform_0(%arg0: i32) -> (i32, i32) {
    %c0_i32 = arith.constant 0 : i32
    %c0_i32_0 = arith.constant 0 : i32
    %c0_i32_1 = arith.constant 0 : i32
    return %c0_i32, %c0_i32_0 : i32, i32
  }
  func.func @transform_1(%arg0: i32) -> (i32, i32) {
    %c0_i32 = arith.constant 0 : i32
    %c0_i32_0 = arith.constant 0 : i32
    %c0_i32_1 = arith.constant 0 : i32
    return %c0_i32, %c0_i32_0 : i32, i32
  }
}

module attributes {stable_mosaic.version = 11 : i64} {
  func.func @_tsne_fused_kernel(%arg0: i32, %arg1: memref<128x128xf32, #tpu.memory_space<vmem>>, %arg2: memref<8x128xf32, #tpu.memory_space<vmem>>, %arg3: memref<8x128xf32, #tpu.memory_space<vmem>>, %arg4: memref<128x128xf32, #tpu.memory_space<vmem>>) attributes {dimension_semantics = [#tpu.dimension_semantics<arbitrary>], iteration_bounds = array<i64: 1>, scalar_prefetch = 0 : i64, scratch_operands = 1 : i64, tpu.core_type = #tpu.core_type<tc>, window_params = [{pipeline_mode = #tpu.pipeline_mode<synchronous>, transform_indices = @transform_0, window_bounds = array<i64: 128, 128>}, {pipeline_mode = #tpu.pipeline_mode<synchronous>, transform_indices = @transform_1, window_bounds = array<i64: 8, 128>}, {pipeline_mode = #tpu.pipeline_mode<synchronous>, transform_indices = @transform_2, window_bounds = array<i64: 8, 128>}]} {
    %c0 = arith.constant 0 : index
    %c0_0 = arith.constant 0 : index
    %0 = vector.load %arg1[%c0, %c0_0] : memref<128x128xf32, #tpu.memory_space<vmem>>, vector<128x128xf32>
    %cst = arith.constant 1.200000e+01 : f32
    %1 = vector.broadcast %cst : f32 to vector<128x128xf32>
    %2 = arith.mulf %0, %1 : vector<128x128xf32>
    %c0_1 = arith.constant 0 : index
    %c0_2 = arith.constant 0 : index
    %3 = vector.load %arg4[%c0_1, %c0_2] : memref<128x128xf32, #tpu.memory_space<vmem>>, vector<128x128xf32>
    tpu.vector_store %arg4[%c0_1, %c0_2], %2 {strides = array<i32>} : memref<128x128xf32, #tpu.memory_space<vmem>>, vector<128x128xf32>,
    %4 = tpu.iota {dimensions = array<i32: 0>} : vector<8x128xi32>
    %c0_3 = arith.constant 0 : index
    %c0_4 = arith.constant 0 : index
    %5 = vector.load %arg2[%c0_3, %c0_4] : memref<8x128xf32, #tpu.memory_space<vmem>>, vector<8x128xf32>
    %cst_5 = arith.constant 0.000000e+00 : f32
    %6 = vector.broadcast %cst_5 : f32 to vector<8x128xf32>
    %cst_6 = arith.constant 1.000000e+00 : f32
    %7 = vector.broadcast %cst_6 : f32 to vector<8x128xf32>
    %cst_7 = arith.constant 5.000000e-01 : f32
    %cst_8 = arith.constant 8.000000e+02 : f32
    %c0_i32 = arith.constant 0 : i32
    %c250_i32 = arith.constant 250 : i32
    %8 = arith.addi %c0_i32, %c250_i32 : i32
    %c1_i32 = arith.constant 1 : i32
    %9:3 = scf.for %arg5 = %c0_i32 to %8 step %c1_i32 iter_args(%arg6 = %5, %arg7 = %6, %arg8 = %7) -> (vector<8x128xf32>, vector<8x128xf32>, vector<8x128xf32>)  : i32 {
      %13 = arith.mulf %arg6, %arg6 : vector<8x128xf32>
      %cst_15 = arith.constant dense<0.000000e+00> : vector<128xf32>
      %14 = vector.multi_reduction <add>, %13, %cst_15 [0] : vector<8x128xf32> to vector<128xf32>
      %15 = vector.shape_cast %14 : vector<128xf32> to vector<1x128xf32>
      %c3_i32 = arith.constant 3 : i32
      %16 = vector.broadcast %c3_i32 : i32 to vector<8x128xi32>
      %17 = arith.cmpi eq, %4, %16 : vector<8x128xi32>
      %18 = vector.shape_cast %15 : vector<1x128xf32> to vector<1x128xf32>
      %19 = vector.broadcast %18 : vector<1x128xf32> to vector<8x128xf32>
      %20 = arith.select %17, %19, %arg6 : vector<8x128xi1>, vector<8x128xf32>
      %c2_i32 = arith.constant 2 : i32
      %21 = vector.broadcast %c2_i32 : i32 to vector<8x128xi32>
      %22 = arith.cmpi eq, %4, %21 : vector<8x128xi32>
      %cst_16 = arith.constant 1.000000e+00 : f32
      %23 = vector.broadcast %cst_16 : f32 to vector<1x128xf32>
      %24 = arith.subf %15, %23 : vector<1x128xf32>
      %c3_i32_17 = arith.constant 3 : i32
      %25 = vector.broadcast %c3_i32_17 : i32 to vector<8x128xi32>
      %26 = arith.cmpi eq, %4, %25 : vector<8x128xi32>
      %cst_18 = arith.constant -2.000000e+00 : f32
      %27 = vector.broadcast %cst_18 : f32 to vector<8x128xf32>
      %28 = arith.mulf %27, %arg6 : vector<8x128xf32>
      %cst_19 = arith.constant 1.000000e+00 : f32
      %29 = vector.broadcast %cst_19 : f32 to vector<8x128xf32>
      %30 = arith.select %26, %29, %28 : vector<8x128xi1>, vector<8x128xf32>
      %31 = vector.shape_cast %24 : vector<1x128xf32> to vector<1x128xf32>
      %32 = vector.broadcast %31 : vector<1x128xf32> to vector<8x128xf32>
      %33 = arith.select %22, %32, %30 : vector<8x128xi1>, vector<8x128xf32>
      %cst_20 = arith.constant dense<0.000000e+00> : vector<128x128xf32>
      %34 = tpu.matmul %20, %33, %cst_20 {dimension_numbers = #tpu.dot_dimension_numbers<[0], [0], [1], [1], [0, 1, 1, 1], [], []>} : vector<8x128xf32>, vector<8x128xf32>, vector<128x128xf32> -> vector<128x128xf32>
      %cst_21 = arith.constant 1.000000e+00 : f32
      %35 = vector.broadcast %cst_21 : f32 to vector<128x128xf32>
      %36 = arith.maximumf %34, %35 : vector<128x128xf32>
      %37 = tpu.reciprocal %36 {approx = true} : vector<128x128xf32> -> vector<128x128xf32>
      %38 = vector.shape_cast %37 : vector<128x128xf32> to vector<1x128x128xf32>
      %cst_22 = arith.constant dense<0.000000e+00> : vector<1xf32>
      %39 = vector.multi_reduction <add>, %38, %cst_22 [1, 2] : vector<1x128x128xf32> to vector<1xf32>
      %40 = vector.shape_cast %39 : vector<1xf32> to vector<1x1x1xf32>
      %41 = vector.extract %40[0, 0, 0] : f32 from vector<1x1x1xf32>
      %cst_23 = arith.constant 1.280000e+02 : f32
      %42 = arith.subf %41, %cst_23 : f32
      %cst_24 = arith.constant 9.99999997E-7 : f32
      %43 = arith.maximumf %42, %cst_24 : f32
      %c0_25 = arith.constant 0 : index
      %c0_26 = arith.constant 0 : index
      %44 = vector.load %arg4[%c0_25, %c0_26] : memref<128x128xf32, #tpu.memory_space<vmem>>, vector<128x128xf32>
      %cst_27 = arith.constant 1.000000e+00 : f32
      %45 = arith.divf %cst_27, %43 : f32
      %46 = vector.broadcast %45 : f32 to vector<128x128xf32>
      %47 = arith.mulf %37, %46 : vector<128x128xf32>
      %48 = arith.subf %44, %47 : vector<128x128xf32>
      %49 = arith.mulf %48, %37 : vector<128x128xf32>
      %cst_28 = arith.constant dense<0.000000e+00> : vector<8x128xf32>
      %50 = tpu.matmul %arg6, %49, %cst_28 {dimension_numbers = #tpu.dot_dimension_numbers<[1], [0], [0], [1], [0, 0, 1, 1], [], []>} : vector<8x128xf32>, vector<128x128xf32>, vector<8x128xf32> -> vector<8x128xf32>
      %51 = vector.extract_strided_slice %50 {offsets = [2, 0], sizes = [1, 128], strides = [1, 1]} : vector<8x128xf32> to vector<1x128xf32>
      %52 = vector.broadcast %51 : vector<1x128xf32> to vector<8x128xf32>
      %53 = arith.mulf %52, %arg6 : vector<8x128xf32>
      %54 = arith.subf %53, %50 : vector<8x128xf32>
      %cst_29 = arith.constant 0.000000e+00 : f32
      %55 = vector.broadcast %cst_29 : f32 to vector<8x128xf32>
      %56 = arith.cmpf ogt, %54, %55 : vector<8x128xf32>
      %cst_30 = arith.constant 0.000000e+00 : f32
      %57 = vector.broadcast %cst_30 : f32 to vector<8x128xf32>
      %58 = arith.cmpf ogt, %arg7, %57 : vector<8x128xf32>
      %59 = arith.xori %56, %58 : vector<8x128xi1>
      %cst_31 = arith.constant dense<true> : vector<8x128xi1>
      %60 = arith.xori %59, %cst_31 : vector<8x128xi1>
      %cst_32 = arith.constant 8.000000e-01 : f32
      %61 = vector.broadcast %cst_32 : f32 to vector<8x128xf32>
      %62 = arith.mulf %arg8, %61 : vector<8x128xf32>
      %cst_33 = arith.constant 2.000000e-01 : f32
      %63 = vector.broadcast %cst_33 : f32 to vector<8x128xf32>
      %64 = arith.addf %arg8, %63 : vector<8x128xf32>
      %65 = arith.select %60, %62, %64 : vector<8x128xi1>, vector<8x128xf32>
      %cst_34 = arith.constant 0.00999999977 : f32
      %66 = vector.broadcast %cst_34 : f32 to vector<8x128xf32>
      %67 = arith.maximumf %65, %66 : vector<8x128xf32>
      %68 = vector.broadcast %cst_7 : f32 to vector<8x128xf32>
      %69 = arith.mulf %68, %arg7 : vector<8x128xf32>
      %70 = vector.broadcast %cst_8 : f32 to vector<8x128xf32>
      %71 = arith.mulf %70, %67 : vector<8x128xf32>
      %72 = arith.mulf %71, %54 : vector<8x128xf32>
      %73 = arith.subf %69, %72 : vector<8x128xf32>
      %74 = arith.addf %arg6, %73 : vector<8x128xf32>
      scf.yield %74, %73, %67 : vector<8x128xf32>, vector<8x128xf32>, vector<8x128xf32>
    }
    %cst_9 = arith.constant 8.000000e-01 : f32
    %cst_10 = arith.constant 8.000000e+02 : f32
    %c0_i32_11 = arith.constant 0 : i32
    %c750_i32 = arith.constant 750 : i32
    %10 = arith.addi %c0_i32_11, %c750_i32 : i32
    %c1_i32_12 = arith.constant 1 : i32
    %11:3 = scf.for %arg5 = %c0_i32_11 to %10 step %c1_i32_12 iter_args(%arg6 = %9#0, %arg7 = %9#1, %arg8 = %9#2) -> (vector<8x128xf32>, vector<8x128xf32>, vector<8x128xf32>)  : i32 {
      %13 = arith.mulf %arg6, %arg6 : vector<8x128xf32>
      %cst_15 = arith.constant dense<0.000000e+00> : vector<128xf32>
      %14 = vector.multi_reduction <add>, %13, %cst_15 [0] : vector<8x128xf32> to vector<128xf32>
      %15 = vector.shape_cast %14 : vector<128xf32> to vector<1x128xf32>
      %c3_i32 = arith.constant 3 : i32
      %16 = vector.broadcast %c3_i32 : i32 to vector<8x128xi32>
      %17 = arith.cmpi eq, %4, %16 : vector<8x128xi32>
      %18 = vector.shape_cast %15 : vector<1x128xf32> to vector<1x128xf32>
      %19 = vector.broadcast %18 : vector<1x128xf32> to vector<8x128xf32>
      %20 = arith.select %17, %19, %arg6 : vector<8x128xi1>, vector<8x128xf32>
      %c2_i32 = arith.constant 2 : i32
      %21 = vector.broadcast %c2_i32 : i32 to vector<8x128xi32>
      %22 = arith.cmpi eq, %4, %21 : vector<8x128xi32>
      %cst_16 = arith.constant 1.000000e+00 : f32
      %23 = vector.broadcast %cst_16 : f32 to vector<1x128xf32>
      %24 = arith.subf %15, %23 : vector<1x128xf32>
      %c3_i32_17 = arith.constant 3 : i32
      %25 = vector.broadcast %c3_i32_17 : i32 to vector<8x128xi32>
      %26 = arith.cmpi eq, %4, %25 : vector<8x128xi32>
      %cst_18 = arith.constant -2.000000e+00 : f32
      %27 = vector.broadcast %cst_18 : f32 to vector<8x128xf32>
      %28 = arith.mulf %27, %arg6 : vector<8x128xf32>
      %cst_19 = arith.constant 1.000000e+00 : f32
      %29 = vector.broadcast %cst_19 : f32 to vector<8x128xf32>
      %30 = arith.select %26, %29, %28 : vector<8x128xi1>, vector<8x128xf32>
      %31 = vector.shape_cast %24 : vector<1x128xf32> to vector<1x128xf32>
      %32 = vector.broadcast %31 : vector<1x128xf32> to vector<8x128xf32>
      %33 = arith.select %22, %32, %30 : vector<8x128xi1>, vector<8x128xf32>
      %cst_20 = arith.constant dense<0.000000e+00> : vector<128x128xf32>
      %34 = tpu.matmul %20, %33, %cst_20 {dimension_numbers = #tpu.dot_dimension_numbers<[0], [0], [1], [1], [0, 1, 1, 1], [], []>} : vector<8x128xf32>, vector<8x128xf32>, vector<128x128xf32> -> vector<128x128xf32>
      %cst_21 = arith.constant 1.000000e+00 : f32
      %35 = vector.broadcast %cst_21 : f32 to vector<128x128xf32>
      %36 = arith.maximumf %34, %35 : vector<128x128xf32>
      %37 = tpu.reciprocal %36 {approx = true} : vector<128x128xf32> -> vector<128x128xf32>
      %38 = vector.shape_cast %37 : vector<128x128xf32> to vector<1x128x128xf32>
      %cst_22 = arith.constant dense<0.000000e+00> : vector<1xf32>
      %39 = vector.multi_reduction <add>, %38, %cst_22 [1, 2] : vector<1x128x128xf32> to vector<1xf32>
      %40 = vector.shape_cast %39 : vector<1xf32> to vector<1x1x1xf32>
      %41 = vector.extract %40[0, 0, 0] : f32 from vector<1x1x1xf32>
      %cst_23 = arith.constant 1.280000e+02 : f32
      %42 = arith.subf %41, %cst_23 : f32
      %cst_24 = arith.constant 9.99999997E-7 : f32
      %43 = arith.maximumf %42, %cst_24 : f32
      %c0_25 = arith.constant 0 : index
      %c0_26 = arith.constant 0 : index
      %44 = vector.load %arg1[%c0_25, %c0_26] : memref<128x128xf32, #tpu.memory_space<vmem>>, vector<128x128xf32>
      %cst_27 = arith.constant 1.000000e+00 : f32
      %45 = arith.divf %cst_27, %43 : f32
      %46 = vector.broadcast %45 : f32 to vector<128x128xf32>
      %47 = arith.mulf %37, %46 : vector<128x128xf32>
      %48 = arith.subf %44, %47 : vector<128x128xf32>
      %49 = arith.mulf %48, %37 : vector<128x128xf32>
      %cst_28 = arith.constant dense<0.000000e+00> : vector<8x128xf32>
      %50 = tpu.matmul %arg6, %49, %cst_28 {dimension_numbers = #tpu.dot_dimension_numbers<[1], [0], [0], [1], [0, 0, 1, 1], [], []>} : vector<8x128xf32>, vector<128x128xf32>, vector<8x128xf32> -> vector<8x128xf32>
      %51 = vector.extract_strided_slice %50 {offsets = [2, 0], sizes = [1, 128], strides = [1, 1]} : vector<8x128xf32> to vector<1x128xf32>
      %52 = vector.broadcast %51 : vector<1x128xf32> to vector<8x128xf32>
      %53 = arith.mulf %52, %arg6 : vector<8x128xf32>
      %54 = arith.subf %53, %50 : vector<8x128xf32>
      %cst_29 = arith.constant 0.000000e+00 : f32
      %55 = vector.broadcast %cst_29 : f32 to vector<8x128xf32>
      %56 = arith.cmpf ogt, %54, %55 : vector<8x128xf32>
      %cst_30 = arith.constant 0.000000e+00 : f32
      %57 = vector.broadcast %cst_30 : f32 to vector<8x128xf32>
      %58 = arith.cmpf ogt, %arg7, %57 : vector<8x128xf32>
      %59 = arith.xori %56, %58 : vector<8x128xi1>
      %cst_31 = arith.constant dense<true> : vector<8x128xi1>
      %60 = arith.xori %59, %cst_31 : vector<8x128xi1>
      %cst_32 = arith.constant 8.000000e-01 : f32
      %61 = vector.broadcast %cst_32 : f32 to vector<8x128xf32>
      %62 = arith.mulf %arg8, %61 : vector<8x128xf32>
      %cst_33 = arith.constant 2.000000e-01 : f32
      %63 = vector.broadcast %cst_33 : f32 to vector<8x128xf32>
      %64 = arith.addf %arg8, %63 : vector<8x128xf32>
      %65 = arith.select %60, %62, %64 : vector<8x128xi1>, vector<8x128xf32>
      %cst_34 = arith.constant 0.00999999977 : f32
      %66 = vector.broadcast %cst_34 : f32 to vector<8x128xf32>
      %67 = arith.maximumf %65, %66 : vector<8x128xf32>
      %68 = vector.broadcast %cst_9 : f32 to vector<8x128xf32>
      %69 = arith.mulf %68, %arg7 : vector<8x128xf32>
      %70 = vector.broadcast %cst_10 : f32 to vector<8x128xf32>
      %71 = arith.mulf %70, %67 : vector<8x128xf32>
      %72 = arith.mulf %71, %54 : vector<8x128xf32>
      %73 = arith.subf %69, %72 : vector<8x128xf32>
      %74 = arith.addf %arg6, %73 : vector<8x128xf32>
      scf.yield %74, %73, %67 : vector<8x128xf32>, vector<8x128xf32>, vector<8x128xf32>
    }
    %c0_13 = arith.constant 0 : index
    %c0_14 = arith.constant 0 : index
    %12 = vector.load %arg3[%c0_13, %c0_14] : memref<8x128xf32, #tpu.memory_space<vmem>>, vector<8x128xf32>
    tpu.vector_store %arg3[%c0_13, %c0_14], %11#0 {strides = array<i32>} : memref<8x128xf32, #tpu.memory_space<vmem>>, vector<8x128xf32>,
    return
  }
  func.func @transform_0(%arg0: i32) -> (i32, i32) {
    %c0_i32 = arith.constant 0 : i32
    %c0_i32_0 = arith.constant 0 : i32
    %c0_i32_1 = arith.constant 0 : i32
    return %c0_i32, %c0_i32_0 : i32, i32
  }
  func.func @transform_1(%arg0: i32) -> (i32, i32) {
    %c0_i32 = arith.constant 0 : i32
    %c0_i32_0 = arith.constant 0 : i32
    %c0_i32_1 = arith.constant 0 : i32
    return %c0_i32, %c0_i32_0 : i32, i32
  }
  func.func @transform_2(%arg0: i32) -> (i32, i32) {
    %c0_i32 = arith.constant 0 : i32
    %c0_i32_0 = arith.constant 0 : i32
    %c0_i32_1 = arith.constant 0 : i32
    return %c0_i32, %c0_i32_0 : i32, i32
  }
}

</mosaic_0001>

<bundles_post_ra>
// kernel: neg.3
= control target key start
LH: loop header
LB: loop body
LE: loop exit
PB: predicated region body
PF: predicated region fallthrough
CT: control target
= control target key end

     0   :  { %s264_s0 = inlined_call_operand.vmem [shape: f32[128,128], index: 0, kind: input, shape index: {}]   ;;  %s265_s1 = inlined_call_operand.vmem [shape: f32[128,128], index: 1, kind: output, shape index: {}]  }
   0x1   :  { %v2_v0 = vld [vmem:[%s264_s0] sm:$0xff]  ;;  %v128_v1 = vld [vmem:[%s264_s0 + $0x8] sm:$0xff]  ;;  %v130_v2 = vld [vmem:[%s264_s0 + $0x10] sm:$0xff] }
   0x2   :  { %v5_v3 = vxor.u32 2147483648, %v2_v0  ;;  %v12_v4 = vxor.u32 2147483648, %v128_v1  ;;  %v20_v5 = vxor.u32 2147483648, %v130_v2  ;;  %v132_v6 = vld [vmem:[%s264_s0 + $0x18] sm:$0xff]  ;;  %v134_v7 = vld [vmem:[%s264_s0 + $0x20] sm:$0xff]  ;;  %v136_v8 = vld [vmem:[%s264_s0 + $0x28] sm:$0xff] }
   0x3   :  { %v28_v9 = vxor.u32 2147483648, %v132_v6  ;;  %v36_v10 = vxor.u32 2147483648, %v134_v7  ;;  %v44_v11 = vxor.u32 2147483648, %v136_v8  ;;  %v138_v12 = vld [vmem:[%s264_s0 + $0x30] sm:$0xff]  ;;  %v140_v13 = vld [vmem:[%s264_s0 + $0x38] sm:$0xff]  ;;  %v142_v14 = vld [vmem:[%s264_s0 + $0x40] sm:$0xff] }
   0x4   :  { %7 = vst [vmem:[%s265_s1] sm:$0xff] %v5_v3  ;;  %129 = vst [vmem:[%s265_s1 + $0x8] sm:$0xff] %v12_v4  ;;  %v52_v15 = vxor.u32 2147483648, %v138_v12  ;;  %v60_v16 = vxor.u32 2147483648, %v140_v13  ;;  %v68_v17 = vxor.u32 2147483648, %v142_v14  ;;  %v144_v18 = vld [vmem:[%s264_s0 + $0x48] sm:$0xff]  ;;  %v146_v19 = vld [vmem:[%s264_s0 + $0x50] sm:$0xff] }
   0x5   :  { %131 = vst [vmem:[%s265_s1 + $0x10] sm:$0xff] %v20_v5  ;;  %v148_v20 = vld [vmem:[%s264_s0 + $0x58] sm:$0xff]  ;;  %133 = vst [vmem:[%s265_s1 + $0x18] sm:$0xff] %v28_v9  ;;  %v76_v21 = vxor.u32 2147483648, %v144_v18  ;;  %v84_v22 = vxor.u32 2147483648, %v146_v19  ;;  %v150_v24 = vld [vmem:[%s264_s0 + $0x60] sm:$0xff] }
   0x6   :  { %135 = vst [vmem:[%s265_s1 + $0x20] sm:$0xff] %v36_v10  ;;  %137 = vst [vmem:[%s265_s1 + $0x28] sm:$0xff] %v44_v11  ;;  %v92_v23 = vxor.u32 2147483648, %v148_v20  ;;  %v152_v25 = vld [vmem:[%s264_s0 + $0x68] sm:$0xff]  ;;  %v154_v26 = vld [vmem:[%s264_s0 + $0x70] sm:$0xff]  ;;  %v100_v27 = vxor.u32 2147483648, %v150_v24 }
   0x7   :  { %139 = vst [vmem:[%s265_s1 + $0x30] sm:$0xff] %v52_v15  ;;  %141 = vst [vmem:[%s265_s1 + $0x38] sm:$0xff] %v60_v16  ;;  %v108_v28 = vxor.u32 2147483648, %v152_v25  ;;  %v116_v29 = vxor.u32 2147483648, %v154_v26  ;;  %v156_v30 = vld [vmem:[%s264_s0 + $0x78] sm:$0xff] }
   0x8   :  { %143 = vst [vmem:[%s265_s1 + $0x40] sm:$0xff] %v68_v17  ;;  %145 = vst [vmem:[%s265_s1 + $0x48] sm:$0xff] %v76_v21  ;;  %v124_v31 = vxor.u32 2147483648, %v156_v30 }
   0x9   :  { %147 = vst [vmem:[%s265_s1 + $0x50] sm:$0xff] %v84_v22  ;;  %149 = vst [vmem:[%s265_s1 + $0x58] sm:$0xff] %v92_v23 }
   0xa   :  { %151 = vst [vmem:[%s265_s1 + $0x60] sm:$0xff] %v100_v27  ;;  %153 = vst [vmem:[%s265_s1 + $0x68] sm:$0xff] %v108_v28 }
   0xb   :  { %155 = vst [vmem:[%s265_s1 + $0x70] sm:$0xff] %v116_v29  ;;  %157 = vst [vmem:[%s265_s1 + $0x78] sm:$0xff] %v124_v31 }

// kernel: custom-call
= control target key start
LH: loop header
LB: loop body
LE: loop exit
PB: predicated region body
PF: predicated region fallthrough
CT: control target
= control target key end

     0   :  { %s6_s0 = inlined_call_operand.vmem [shape: f32[128], index: 0, kind: output, shape index: {}]  }

// kernel: tsne_fit_transform.2
= control target key start
LH: loop header
LB: loop body
LE: loop exit
PB: predicated region body
PF: predicated region fallthrough
CT: control target
= control target key end

     0   :  { %vm40_vm0 = vcmask 261120   ;;  %s884_s0 = inlined_call_operand.vmem [shape: f32[128,32], index: 0, kind: input, shape index: {}]   ;;  %s885_s1 = inlined_call_operand.vmem [shape: f32[128,128], index: 1, kind: output, shape index: {}]  }
   0x1   :  { %v8_v0 = vld [vmem:[%s884_s0] sm:$0xff]  ;;  %v602_v1 = vld [vmem:[%s884_s0 + $0x8] sm:$0xff]  ;;  %vm606_vm1 = vmpackc.low %vm40_vm0, %vm40_vm0 }
   0x2   :  { %v522_v3 = vpack.c.bf16 %v602_v1, %v8_v0  ;;  %v24_v4 = vmul.f32 %v8_v0, %v8_v0  ;;  %v614_v5 = vld [vmem:[%s884_s0 + $0x10] sm:$0xff]  ;;  %v619_v6 = vld [vmem:[%s884_s0 + $0x18] sm:$0xff]  ;;  %498 = vmatprep.mubr.msk.f32.mxu0 %vm40_vm0, %v8_v0  ;;  %v25_v7 = vmul.f32 %v602_v1, %v602_v1  ;;  %v643_v13 = vld [vmem:[%s884_s0 + $0x20] sm:$0xff] }
   0x3   :  { %v528_v8 = vpack.c.bf16 %v619_v6, %v614_v5  ;;  %v26_v9 = vmul.f32 %v614_v5, %v614_v5  ;;  %v27_v11 = vmul.f32 %v619_v6, %v619_v6  ;;  %v653_v15 = vld [vmem:[%s884_s0 + $0x28] sm:$0xff]  ;;  %v16_v16 = vld [vmem:[%s884_s0 + $0x40] sm:$0xff]  ;;  %v28_v18 = vmul.f32 %v643_v13, %v643_v13  ;;  %v667_v20 = vld [vmem:[%s884_s0 + $0x30] sm:$0xff] }
   0x4   :  { %524 = vmatprep.subr.msk.bf16.mxu0 %vm606_vm1, %v522_v3  ;;  %570 = vmatprep.subr.msk.bf16.mxu1 %vm606_vm1, %v522_v3  ;;  %v41_v10 = vsel %vm40_vm0, %v24_v4, 0.0  ;;  %v44_v14 = vsel %vm40_vm0, %v25_v7, 0.0  ;;  %v29_v19 = vmul.f32 %v653_v15, %v653_v15  ;;  %v534_v21 = vpack.c.bf16 %v653_v15, %v643_v13  ;;  %v674_v22 = vld [vmem:[%s884_s0 + $0x38] sm:$0xff]  ;;  %v693_v27 = vld [vmem:[%s884_s0 + $0x48] sm:$0xff]  ;;  %v18_v32 = vld [vmem:[%s884_s0 + $0x50] sm:$0xff] }
   0x5   :  { %527 = vmatpush3.bf16.xpose.msk.msra.mxu0 %vm606_vm1, %v522_v3  ;;  %578 = vmatpush3.bf16.xpose.msk.msra.mxu1 %vm606_vm1, %v522_v3  ;;  %v47_v12 = vsel %vm40_vm0, %v26_v9, 0.0  ;;  %v50_v17 = vsel %vm40_vm0, %v27_v11, 0.0  ;;  %v53_v23 = vsel %vm40_vm0, %v28_v18, 0.0  ;;  %v30_v25 = vmul.f32 %v667_v20, %v667_v20  ;;  %v19_v34 = vld [vmem:[%s884_s0 + $0x58] sm:$0xff]  ;;  %v20_v39 = vld [vmem:[%s884_s0 + $0x60] sm:$0xff]  ;;  %v21_v40 = vld [vmem:[%s884_s0 + $0x68] sm:$0xff] }
   0x6   :  { %42 = vadd.xlane.f32.xlu0 %v41_v10  ;;  %530 = vmatprep.subr.msk.bf16.mxu0 %vm606_vm1, %v528_v8  ;;  %v56_v24 = vsel %vm40_vm0, %v29_v19, 0.0  ;;  %v31_v26 = vmul.f32 %v674_v22, %v674_v22  ;;  %v32_v30 = vmul.f32 %v16_v16, %v16_v16  ;;  %v33_v31 = vmul.f32 %v693_v27, %v693_v27  ;;  %v22_v45 = vld [vmem:[%s884_s0 + $0x70] sm:$0xff]  ;;  %v23_v47 = vld [vmem:[%s884_s0 + $0x78] sm:$0xff] }
   0x7   :  { %571 = vmatprep.subr.msk.bf16.mxu1 %vm606_vm1, %v528_v8  ;;  %48 = vadd.xlane.f32.xlu1 %v47_v12  ;;  %v59_v28 = vsel %vm40_vm0, %v30_v25, 0.0  ;;  %v540_v33 = vpack.c.bf16 %v674_v22, %v667_v20  ;;  %v34_v37 = vmul.f32 %v18_v32, %v18_v32  ;;  %v35_v38 = vmul.f32 %v19_v34, %v19_v34 }
   0x8   :  { %510 = vmatprep.mubr.msk.f32.mxu1 %vm40_vm0, %v16_v16  ;;  %v62_v29 = vsel %vm40_vm0, %v31_v26, 0.0  ;;  %v65_v35 = vsel %vm40_vm0, %v32_v30, 0.0  ;;  %v68_v36 = vsel %vm40_vm0, %v33_v31, 0.0  ;;  %v36_v43 = vmul.f32 %v20_v39, %v20_v39 }
   0x9   :  { %v71_v41 = vsel %vm40_vm0, %v34_v37, 0.0  ;;  %v74_v42 = vsel %vm40_vm0, %v35_v38, 0.0  ;;  %v37_v44 = vmul.f32 %v21_v40, %v21_v40  ;;  %v546_v46 = vpack.c.bf16 %v693_v27, %v16_v16 }
   0xa   :  { %45 = vadd.xlane.f32.xlu0 %v44_v14  ;;  %v77_v48 = vsel %vm40_vm0, %v36_v43, 0.0  ;;  %v38_v50 = vmul.f32 %v22_v45, %v22_v45  ;;  %v39_v51 = vmul.f32 %v23_v47, %v23_v47  ;;  %v552_v54 = vpack.c.bf16 %v19_v34, %v18_v32 }
   0xb   :  { %51 = vadd.xlane.f32.xlu1 %v50_v17  ;;  %v80_v49 = vsel %vm40_vm0, %v37_v44, 0.0  ;;  %v558_v55 = vpack.c.bf16 %v21_v40, %v20_v39  ;;  %v564_v56 = vpack.c.bf16 %v23_v47, %v22_v45  ;;  %v314_v9 = vlaneseq }
   0xc   :  { %v83_v52 = vsel %vm40_vm0, %v38_v50, 0.0  ;;  %v86_v53 = vsel %vm40_vm0, %v39_v51, 0.0 }
   0xd   :  { %533 = vmatpush3.bf16.xpose.msk.msra.mxu0 %vm606_vm1, %v528_v8  ;;  %579 = vmatpush3.bf16.xpose.msk.msra.mxu1 %vm606_vm1, %v528_v8  ;;  %v315_v10 = vshrl.u32 %v314_v9, 7 }
   0xe   :  { %536 = vmatprep.subr.msk.bf16.mxu0 %vm606_vm1, %v534_v21  ;;  %572 = vmatprep.subr.msk.bf16.mxu1 %vm606_vm1, %v534_v21 }
   0xf   :  { %54 = vadd.xlane.f32.xlu0 %v53_v23  ;;  %57 = vadd.xlane.f32.xlu1 %v56_v24  ;;  %v316_v11 = vsub.s32 0, %v315_v10 }
  0x13   :  { %60 = vadd.xlane.f32.xlu0 %v59_v28  ;;  %63 = vadd.xlane.f32.xlu1 %v62_v29 }
  0x15   :  { %539 = vmatpush3.bf16.xpose.msk.msra.mxu0 %vm606_vm1, %v534_v21  ;;  %580 = vmatpush3.bf16.xpose.msk.msra.mxu1 %vm606_vm1, %v534_v21 }
  0x16   :  { %542 = vmatprep.subr.msk.bf16.mxu0 %vm606_vm1, %v540_v33  ;;  %573 = vmatprep.subr.msk.bf16.mxu1 %vm606_vm1, %v540_v33 }
  0x17   :  { %66 = vadd.xlane.f32.xlu0 %v65_v35  ;;  %69 = vadd.xlane.f32.xlu1 %v68_v36 }
  0x1b   :  { %72 = vadd.xlane.f32.xlu0 %v71_v41  ;;  %75 = vadd.xlane.f32.xlu1 %v74_v42 }
  0x1d   :  { %545 = vmatpush3.bf16.xpose.msk.msra.mxu0 %vm606_vm1, %v540_v33  ;;  %581 = vmatpush3.bf16.xpose.msk.msra.mxu1 %vm606_vm1, %v540_v33 }
  0x1e   :  { %548 = vmatprep.subr.msk.bf16.mxu0 %vm606_vm1, %v546_v46  ;;  %574 = vmatprep.subr.msk.bf16.mxu1 %vm606_vm1, %v546_v46 }
  0x1f   :  { %78 = vadd.xlane.f32.xlu0 %v77_v48  ;;  %81 = vadd.xlane.f32.xlu1 %v80_v49 }
  0x23   :  { %84 = vadd.xlane.f32.xlu0 %v83_v52  ;;  %87 = vadd.xlane.f32.xlu1 %v86_v53 }
  0x25   :  { %551 = vmatpush3.bf16.xpose.msk.msra.mxu0 %vm606_vm1, %v546_v46  ;;  %582 = vmatpush3.bf16.xpose.msk.msra.mxu1 %vm606_vm1, %v546_v46 }
  0x26   :  { %554 = vmatprep.subr.msk.bf16.mxu0 %vm606_vm1, %v552_v54  ;;  %575 = vmatprep.subr.msk.bf16.mxu1 %vm606_vm1, %v552_v54 }
  0x2d   :  { %557 = vmatpush3.bf16.xpose.msk.msra.mxu0 %vm606_vm1, %v552_v54  ;;  %583 = vmatpush3.bf16.xpose.msk.msra.mxu1 %vm606_vm1, %v552_v54 }
  0x2e   :  { %560 = vmatprep.subr.msk.bf16.mxu0 %vm606_vm1, %v558_v55  ;;  %576 = vmatprep.subr.msk.bf16.mxu1 %vm606_vm1, %v558_v55 }
  0x35   :  { %563 = vmatpush3.bf16.xpose.msk.msra.mxu0 %vm606_vm1, %v558_v55  ;;  %584 = vmatpush3.bf16.xpose.msk.msra.mxu1 %vm606_vm1, %v558_v55 }
  0x36   :  { %566 = vmatprep.subr.msk.bf16.mxu0 %vm606_vm1, %v564_v56  ;;  %577 = vmatprep.subr.msk.bf16.mxu1 %vm606_vm1, %v564_v56 }
  0x3d   :  { %569 = vmatpush3.bf16.xpose.msk.msra.mxu0 %vm606_vm1, %v564_v56  ;;  %585 = vmatpush3.bf16.xpose.msk.msra.mxu1 %vm606_vm1, %v564_v56 }
  0x44   :  { %499 = vmatmul.mubr.msk.f32.vlgmr.msra.gmra.mrb[0].mxu0 %vm40_vm0, %v602_v1  ;;  %511 = vmatmul.mubr.msk.f32.vlgmr.msra.gmra.mrb[0].mxu1 %vm40_vm0, %v693_v27 }
  0x45   :  { %501 = vmatprep.mubr.msk.f32.mxu0 %vm40_vm0, %v614_v5  ;;  %513 = vmatprep.mubr.msk.f32.mxu1 %vm40_vm0, %v18_v32 }
  0x48   :  { %502 = vmatmul.mubr.msk.f32.gmra.mrb[2].mxu0 %vm40_vm0, %v619_v6  ;;  %514 = vmatmul.mubr.msk.f32.gmra.mrb[2].mxu1 %vm40_vm0, %v19_v34 }
  0x49   :  { %504 = vmatprep.mubr.msk.f32.mxu0 %vm40_vm0, %v643_v13  ;;  %516 = vmatprep.mubr.msk.f32.mxu1 %vm40_vm0, %v20_v39 }
  0x4c   :  { %505 = vmatmul.mubr.msk.f32.gmra.mrb[4].mxu0 %vm40_vm0, %v653_v15  ;;  %517 = vmatmul.mubr.msk.f32.gmra.mrb[4].mxu1 %vm40_vm0, %v21_v40 }
  0x4d   :  { %507 = vmatprep.mubr.msk.f32.mxu0 %vm40_vm0, %v667_v20  ;;  %519 = vmatprep.mubr.msk.f32.mxu1 %vm40_vm0, %v22_v45 }
  0x50   :  { %508 = vmatmul.mubr.msk.f32.gmra.mrb[6].mxu0 %vm40_vm0, %v674_v22  ;;  %520 = vmatmul.mubr.msk.f32.gmra.mrb[6].mxu1 %vm40_vm0, %v23_v47 }
  0x93   :  { %v43_v57 = vpop.xlane.xlu0 %42 }
  0x94   :  { %282 = vxpose.xlu0.b32.start [1/16] (narrow) %v43_v57, 8  ;;  %v49_v59 = vpop.xlane.xlu1 %48 }
  0x97   :  { %v46_v58 = vpop.xlane.xlu0 %45 }
  0x98   :  { %283 = vxpose.xlu0.b32.cont [2/16] (narrow) %v46_v58, 8  ;;  %v52_v60 = vpop.xlane.xlu1 %51 }
  0x9c   :  { %284 = vxpose.xlu0.b32.cont [3/16] (narrow) %v49_v59, 8  ;;  %v794_v61 = vpop.xlane.xlu0 %54  ;;  %v797_v62 = vpop.xlane.xlu1 %57 }
  0xa0   :  { %285 = vxpose.xlu0.b32.cont [4/16] (narrow) %v52_v60, 8  ;;  %v800_v63 = vpop.xlane.xlu0 %60  ;;  %v803_v0 = vpop.xlane.xlu1 %63 }
  0xa4   :  { %286 = vxpose.xlu0.b32.cont [5/16] (narrow) %v794_v61, 8  ;;  %v67_v1 = vpop.xlane.xlu0 %66  ;;  %v70_v2 = vpop.xlane.xlu1 %69 }
  0xa8   :  { %287 = vxpose.xlu0.b32.cont [6/16] (narrow) %v797_v62, 8  ;;  %v73_v3 = vpop.xlane.xlu0 %72  ;;  %v76_v4 = vpop.xlane.xlu1 %75 }
  0xac   :  { %288 = vxpose.xlu0.b32.cont [7/16] (narrow) %v800_v63, 8  ;;  %v79_v5 = vpop.xlane.xlu0 %78  ;;  %v82_v6 = vpop.xlane.xlu1 %81 }
  0xb0   :  { %289 = vxpose.xlu0.b32.cont [8/16] (narrow) %v803_v0, 8  ;;  %v806_v7 = vpop.xlane.xlu0 %84  ;;  %v809_v8 = vpop.xlane.xlu1 %87 }
  0xb4   :  { %290 = vxpose.xlu0.b32.cont [9/16] (narrow) %v67_v1, 8 }
  0xb8   :  { %291 = vxpose.xlu0.b32.cont [10/16] (narrow) %v70_v2, 8 }
  0xbc   :  { %292 = vxpose.xlu0.b32.cont [11/16] (narrow) %v73_v3, 8 }
  0xc0   :  { %293 = vxpose.xlu0.b32.cont [12/16] (narrow) %v76_v4, 8 }
  0xc4   :  { %294 = vxpose.xlu0.b32.cont [13/16] (narrow) %v79_v5, 8 }
  0xc8   :  { %295 = vxpose.xlu0.b32.cont [14/16] (narrow) %v82_v6, 8 }
  0xcc   :  { %296 = vxpose.xlu0.b32.cont [15/16] (narrow) %v806_v7, 8 }
  0xd0   :  { %297 = vxpose.xlu0.b32.end [16/16] (narrow) %v809_v8, 8 }
 0x114   :  { %v298_v12 = vpop.trf.xlu0 }
 0x115   :  { %v812_v13 = vrot.slane %v298_v12, %v316_v11 }
 0x117   :  { %v500_v14 = vpop.f32.mrb[0].mxu0  ;;  %v512_v15 = vpop.f32.mrb[0].mxu1  ;;  %v319_v16 = vadd.f32 %v812_v13, %v46_v58  ;;  %v327_v18 = vadd.f32 %v812_v13, %v70_v2  ;;  %v318_v22 = vadd.f32 %v812_v13, %v43_v57  ;;  %v326_v24 = vadd.f32 %v812_v13, %v67_v1 }
 0x118   :  { %v335_v17 = vmul.f32 2.0, %v500_v14  ;;  %v343_v19 = vmul.f32 2.0, %v512_v15  ;;  %v203_v20 = vpop.f32.mrb[1].mxu0  ;;  %v243_v21 = vpop.f32.mrb[1].mxu1  ;;  %v321_v28 = vadd.f32 %v812_v13, %v52_v60  ;;  %v329_v29 = vadd.f32 %v812_v13, %v76_v4 }
 0x119   :  { %v334_v23 = vmul.f32 2.0, %v203_v20  ;;  %v342_v25 = vmul.f32 2.0, %v243_v21  ;;  %v320_v34 = vadd.f32 %v812_v13, %v49_v59  ;;  %v328_v35 = vadd.f32 %v812_v13, %v73_v3 }
 0x11a   :  { %v351_v26 = vsub.f32 %v319_v16, %v335_v17  ;;  %v359_v27 = vsub.f32 %v327_v18, %v343_v19  ;;  %v323_v48 = vadd.f32 %v812_v13, %v797_v62  ;;  %v331_v49 = vadd.f32 %v812_v13, %v82_v6 }
 0x11b   :  { %v350_v30 = vsub.f32 %v318_v22, %v334_v23  ;;  %v358_v31 = vsub.f32 %v326_v24, %v342_v25  ;;  %v503_v32 = vpop.f32.mrb[2].mxu0  ;;  %v515_v33 = vpop.f32.mrb[2].mxu1  ;;  %v322_v54 = vadd.f32 %v812_v13, %v794_v61  ;;  %v330_v55 = vadd.f32 %v812_v13, %v79_v5 }
 0x11c   :  { %v367_v36 = vmax.f32 %v351_v26, 0.0  ;;  %v375_v37 = vmax.f32 %v359_v27, 0.0  ;;  %v337_v38 = vmul.f32 2.0, %v503_v32  ;;  %v345_v39 = vmul.f32 2.0, %v515_v33  ;;  %v213_v40 = vpop.f32.mrb[3].mxu0  ;;  %v253_v41 = vpop.f32.mrb[3].mxu1 }
 0x11d   :  { %v366_v42 = vmax.f32 %v350_v30, 0.0  ;;  %v374_v43 = vmax.f32 %v358_v31, 0.0  ;;  %v336_v44 = vmul.f32 2.0, %v213_v40  ;;  %v344_v45 = vmul.f32 2.0, %v253_v41 }
 0x11e   :  { %383 = vst [vmem:[%s885_s1 + $0x8] sm:$0xff] %v367_v36  ;;  %391 = vst [vmem:[%s885_s1 + $0x48] sm:$0xff] %v375_v37  ;;  %v353_v46 = vsub.f32 %v321_v28, %v337_v38  ;;  %v361_v47 = vsub.f32 %v329_v29, %v345_v39  ;;  %v325_v6 = vadd.f32 %v812_v13, %v803_v0 }
 0x11f   :  { %382 = vst [vmem:[%s885_s1] sm:$0xff] %v366_v42  ;;  %390 = vst [vmem:[%s885_s1 + $0x40] sm:$0xff] %v374_v43  ;;  %v352_v50 = vsub.f32 %v320_v34, %v336_v44  ;;  %v360_v51 = vsub.f32 %v328_v35, %v344_v45  ;;  %v506_v52 = vpop.f32.mrb[4].mxu0  ;;  %v518_v53 = vpop.f32.mrb[4].mxu1  ;;  %v333_v9 = vadd.f32 %v812_v13, %v809_v8 }
 0x120   :  { %v369_v56 = vmax.f32 %v353_v46, 0.0  ;;  %v377_v57 = vmax.f32 %v361_v47, 0.0  ;;  %v339_v58 = vmul.f32 2.0, %v506_v52  ;;  %v347_v59 = vmul.f32 2.0, %v518_v53  ;;  %v223_v60 = vpop.f32.mrb[5].mxu0  ;;  %v263_v62 = vpop.f32.mrb[5].mxu1 }
 0x121   :  { %v368_v1 = vmax.f32 %v352_v50, 0.0  ;;  %v376_v2 = vmax.f32 %v360_v51, 0.0  ;;  %v338_v3 = vmul.f32 2.0, %v223_v60  ;;  %v346_v4 = vmul.f32 2.0, %v263_v62 }
 0x122   :  { %385 = vst [vmem:[%s885_s1 + $0x18] sm:$0xff] %v369_v56  ;;  %393 = vst [vmem:[%s885_s1 + $0x58] sm:$0xff] %v377_v57  ;;  %v355_v61 = vsub.f32 %v323_v48, %v339_v58  ;;  %v363_v5 = vsub.f32 %v331_v49, %v347_v59  ;;  %v324_v15 = vadd.f32 %v812_v13, %v800_v63 }
 0x123   :  { %384 = vst [vmem:[%s885_s1 + $0x10] sm:$0xff] %v368_v1  ;;  %392 = vst [vmem:[%s885_s1 + $0x50] sm:$0xff] %v376_v2  ;;  %v354_v10 = vsub.f32 %v322_v54, %v338_v3  ;;  %v362_v11 = vsub.f32 %v330_v55, %v346_v4  ;;  %v509_v12 = vpop.f32.mrb[6].mxu0  ;;  %v521_v14 = vpop.f32.mrb[6].mxu1  ;;  %v332_v0 = vadd.f32 %v812_v13, %v806_v7 }
 0x124   :  { %v371_v16 = vmax.f32 %v355_v61, 0.0  ;;  %v379_v8 = vmax.f32 %v363_v5, 0.0  ;;  %v341_v17 = vmul.f32 2.0, %v509_v12  ;;  %v349_v18 = vmul.f32 2.0, %v521_v14  ;;  %v233_v19 = vpop.f32.mrb[7].mxu0  ;;  %v273_v20 = vpop.f32.mrb[7].mxu1 }
 0x125   :  { %v370_v21 = vmax.f32 %v354_v10, 0.0  ;;  %v378_v22 = vmax.f32 %v362_v11, 0.0  ;;  %v340_v23 = vmul.f32 2.0, %v233_v19  ;;  %v348_v24 = vmul.f32 2.0, %v273_v20 }
 0x126   :  { %387 = vst [vmem:[%s885_s1 + $0x28] sm:$0xff] %v371_v16  ;;  %395 = vst [vmem:[%s885_s1 + $0x68] sm:$0xff] %v379_v8  ;;  %v357_v63 = vsub.f32 %v325_v6, %v341_v17  ;;  %v365_v7 = vsub.f32 %v333_v9, %v349_v18 }
 0x127   :  { %386 = vst [vmem:[%s885_s1 + $0x20] sm:$0xff] %v370_v21  ;;  %394 = vst [vmem:[%s885_s1 + $0x60] sm:$0xff] %v378_v22  ;;  %v356_v13 = vsub.f32 %v324_v15, %v340_v23  ;;  %v364_v25 = vsub.f32 %v332_v0, %v348_v24 }
 0x128   :  { %v373_v26 = vmax.f32 %v357_v63, 0.0  ;;  %v381_v27 = vmax.f32 %v365_v7, 0.0 }
 0x129   :  { %v372_v28 = vmax.f32 %v356_v13, 0.0  ;;  %v380_v29 = vmax.f32 %v364_v25, 0.0 }
 0x12a   :  { %389 = vst [vmem:[%s885_s1 + $0x38] sm:$0xff] %v373_v26  ;;  %397 = vst [vmem:[%s885_s1 + $0x78] sm:$0xff] %v381_v27 }
 0x12b   :  { %388 = vst [vmem:[%s885_s1 + $0x30] sm:$0xff] %v372_v28  ;;  %396 = vst [vmem:[%s885_s1 + $0x70] sm:$0xff] %v380_v29 }

// kernel: tsne_fit_transform.3
= control target key start
LH: loop header
LB: loop body
LE: loop exit
PB: predicated region body
PF: predicated region fallthrough
CT: control target
= control target key end

     0   :  { %v59_v9 = vlaneseq  ;;  %v1589_v35 = vmov 1.0   ;;  %v1591_v36 = vmov 0.0   ;;  %s1595_s15 = smov 0   ;;  %s1983_s0 = inlined_call_operand.vmem [shape: f32[128,128], index: 0, kind: input, shape index: {}]   ;;  %s1984_s2 = inlined_call_operand.vmem [shape: f32[8,128], index: 2, kind: output, shape index: {}]   ;;  %s1985_s1 = inlined_call_operand.vmem [shape: f32[8,128], index: 1, kind: input, shape index: {}]  }
   0x1   :  { %v11_v0 = vld [vmem:[%s1983_s0] sm:$0xff]  ;;  %v12_v1 = vld [vmem:[%s1983_s0 + $0x8] sm:$0xff]  ;;  %v13_v2 = vld [vmem:[%s1983_s0 + $0x10] sm:$0xff] }
   0x2   :  { %v27_v3 = vmul.f32 12.0, %v11_v0  ;;  %v28_v4 = vmul.f32 12.0, %v12_v1  ;;  %v29_v5 = vmul.f32 12.0, %v13_v2  ;;  %v14_v6 = vld [vmem:[%s1983_s0 + $0x18] sm:$0xff]  ;;  %v15_v7 = vld [vmem:[%s1983_s0 + $0x20] sm:$0xff]  ;;  %v16_v8 = vld [vmem:[%s1983_s0 + $0x28] sm:$0xff] }
   0x3   :  { %v30_v10 = vmul.f32 12.0, %v14_v6  ;;  %v31_v11 = vmul.f32 12.0, %v15_v7  ;;  %v32_v12 = vmul.f32 12.0, %v16_v8  ;;  %v17_v13 = vld [vmem:[%s1983_s0 + $0x30] sm:$0xff]  ;;  %v18_v14 = vld [vmem:[%s1983_s0 + $0x38] sm:$0xff]  ;;  %v19_v15 = vld [vmem:[%s1983_s0 + $0x40] sm:$0xff] }
   0x4   :  { %43 = vst [vmem:[#allocation2] sm:$0xff] %v27_v3  ;;  %44 = vst [vmem:[#allocation2 + $0x8] sm:$0xff] %v28_v4  ;;  %v33_v16 = vmul.f32 12.0, %v17_v13  ;;  %v34_v17 = vmul.f32 12.0, %v18_v14  ;;  %v35_v18 = vmul.f32 12.0, %v19_v15  ;;  %v20_v19 = vld [vmem:[%s1983_s0 + $0x48] sm:$0xff] }
   0x5   :  { %45 = vst [vmem:[#allocation2 + $0x10] sm:$0xff] %v29_v5  ;;  %v21_v20 = vld [vmem:[%s1983_s0 + $0x50] sm:$0xff]  ;;  %v22_v21 = vld [vmem:[%s1983_s0 + $0x58] sm:$0xff]  ;;  %46 = vst [vmem:[#allocation2 + $0x18] sm:$0xff] %v30_v10  ;;  %v36_v22 = vmul.f32 12.0, %v20_v19  ;;  %v1584_v32 = vshrl.u32 %v59_v9, 7 }
   0x6   :  { %47 = vst [vmem:[#allocation2 + $0x20] sm:$0xff] %v31_v11  ;;  %48 = vst [vmem:[#allocation2 + $0x28] sm:$0xff] %v32_v12  ;;  %v37_v23 = vmul.f32 12.0, %v21_v20  ;;  %v38_v24 = vmul.f32 12.0, %v22_v21  ;;  %v23_v25 = vld [vmem:[%s1983_s0 + $0x60] sm:$0xff]  ;;  %v24_v26 = vld [vmem:[%s1983_s0 + $0x68] sm:$0xff] }
   0x7   :  { %v25_v27 = vld [vmem:[%s1983_s0 + $0x70] sm:$0xff]  ;;  %49 = vst [vmem:[#allocation2 + $0x30] sm:$0xff] %v33_v16  ;;  %50 = vst [vmem:[#allocation2 + $0x38] sm:$0xff] %v34_v17  ;;  %v39_v28 = vmul.f32 12.0, %v23_v25  ;;  %v40_v29 = vmul.f32 12.0, %v24_v26  ;;  %v26_v31 = vld [vmem:[%s1983_s0 + $0x78] sm:$0xff] }
   0x8   :  { %51 = vst [vmem:[#allocation2 + $0x40] sm:$0xff] %v35_v18  ;;  %v41_v30 = vmul.f32 12.0, %v25_v27  ;;  %v61_v33 = vld [vmem:[%s1985_s1] sm:$0xff]   ;;  %52 = vst [vmem:[#allocation2 + $0x48] sm:$0xff] %v36_v22  ;;  %v42_v34 = vmul.f32 12.0, %v26_v31 }
   0x9   :  { %53 = vst [vmem:[#allocation2 + $0x50] sm:$0xff] %v37_v23  ;;  %54 = vst [vmem:[#allocation2 + $0x58] sm:$0xff] %v38_v24 }
   0xa   :  { %55 = vst [vmem:[#allocation2 + $0x60] sm:$0xff] %v39_v28  ;;  %56 = vst [vmem:[#allocation2 + $0x68] sm:$0xff] %v40_v29 }
   0xb   :  { %57 = vst [vmem:[#allocation2 + $0x70] sm:$0xff] %v41_v30  ;;  %58 = vst [vmem:[#allocation2 + $0x78] sm:$0xff] %v42_v34 }
   0xc LB: > { %v71_v37 = vmul.f32 %v1489_v33, %v1489_v33  ;;  %vm78_vm0 = vcmp.eq.s32.totalorder %v1584_v32, 3  ;;  %v82_v45 = vmul.f32 -2.0, %v1489_v33  ;;  %vm80_vm1 = vcmp.eq.s32.totalorder %v1584_v32, 2  ;;  %s1514_s17 = smov 1e-06   ;;  %s67_s15 = sadd.s32 1, %s1493_s15   ;;  %s1493_s15 = sphi %s1595_s15, %s67_s15   ;;  %v1489_v33 = vphi %v61_v33, %v1988_v33   ;;  %v1485_v36 = vphi %v1591_v36, %v1987_v36   ;;  %v1481_v35 = vphi %v1589_v35, %v1986_v35  }
   0xd   : > { %vm117_vm2 = vcmask 64512   ;;  %vm1512_vm3 = vmmov 0   ;;  %vm514_vm4 = vcmp.gt.f32.partialorder %v1485_v36, 0.0  ;;  %vm1515_vm7 = vmmov 1   ;;  %p64_p0 = scmp.ge.s32.totalorder %s67_s15, 250  }
   0xe   : > { %v72_v38 = vrot.slane %v71_v37, 4  ;;  %v83_v47 = vsel %vm78_vm0, 1.0, %v82_v45  ;;  %s1768_s20 = smov (%p64_p0), 0  }
  0x10   : > { %v73_v39 = vadd.f32 %v72_v38, %v71_v37 }
  0x12   : > { %v74_v40 = vrot.slane %v73_v39, 2 }
  0x14   : > { %v75_v41 = vadd.f32 %v74_v40, %v73_v39 }
  0x16   : > { %v76_v42 = vrot.slane %v75_v41, 1 }
  0x18   : > { %v77_v43 = vadd.f32 %v76_v42, %v75_v41 }
  0x1a   : > { %v79_v44 = vsel %vm78_vm0, %v77_v43, %v1489_v33  ;;  %v1023_v46 = vadd.f32 -1.0, %v77_v43 }
  0x1b   : > { %85 = vxpose.xlu0.b32.start.end [1/1] (short) %v79_v44, 128 }
  0x1c   : > { %v84_v48 = vsel %vm80_vm1, %v1023_v46, %v83_v47 }
  0x1d   : > { %1127 = vmatprep.subr.mxu0 %v84_v48 }
  0x1e   : > { %1128 = vmatpush3.msra.mxu0 %v84_v48 }
  0x9b   : > { %v101_v49 = vpop.trf.xlu0 }
  0x9c   : > { %1129 = vmatprep.mubr.msk.f32.mxu0 %vm117_vm2, %v101_v49 }
  0x9f   : > { %v102_v50 = vpop.trf.xlu0 }
  0xa0   : > { %1130 = vmatmul.mubr.msk.f32.vlgmr.msra.gmra.mrb[0].mxu0 %vm117_vm2, %v102_v50 }
  0xa3   : > { %v103_v51 = vpop.trf.xlu0 }
  0xa4   : > { %1132 = vmatprep.mubr.msk.f32.mxu0 %vm117_vm2, %v103_v51 }
  0xa7   : > { %v104_v52 = vpop.trf.xlu0 }
  0xa8   : > { %1133 = vmatmul.mubr.msk.f32.gmra.mrb[2].mxu0 %vm117_vm2, %v104_v52 }
  0xab   : > { %v105_v53 = vpop.trf.xlu0 }
  0xac   : > { %1135 = vmatprep.mubr.msk.f32.mxu0 %vm117_vm2, %v105_v53 }
  0xaf   : > { %v106_v54 = vpop.trf.xlu0 }
  0xb0   : > { %1136 = vmatmul.mubr.msk.f32.gmra.mrb[4].mxu0 %vm117_vm2, %v106_v54 }
  0xb3   : > { %v107_v55 = vpop.trf.xlu0 }
  0xb4   : > { %1138 = vmatprep.mubr.msk.f32.mxu0 %vm117_vm2, %v107_v55 }
  0xb7   : > { %v108_v56 = vpop.trf.xlu0 }
  0xb8   : > { %1139 = vmatmul.mubr.msk.f32.gmra.mrb[6].mxu0 %vm117_vm2, %v108_v56 }
  0xbb   : > { %v109_v57 = vpop.trf.xlu0 }
  0xbc   : > { %1141 = vmatprep.mubr.msk.f32.mxu0 %vm117_vm2, %v109_v57 }
  0xbf   : > { %v110_v58 = vpop.trf.xlu0 }
  0xc0   : > { %1142 = vmatmul.mubr.msk.f32.gmra.mrb[8].mxu0 %vm117_vm2, %v110_v58 }
  0xc3   : > { %v111_v59 = vpop.trf.xlu0 }
  0xc4   : > { %1144 = vmatprep.mubr.msk.f32.mxu0 %vm117_vm2, %v111_v59 }
  0xc7   : > { %v112_v60 = vpop.trf.xlu0 }
  0xc8   : > { %1145 = vmatmul.mubr.msk.f32.gmra.mrb[10].mxu0 %vm117_vm2, %v112_v60 }
  0xcb   : > { %v113_v61 = vpop.trf.xlu0 }
  0xcc   : > { %1147 = vmatprep.mubr.msk.f32.mxu0 %vm117_vm2, %v113_v61 }
  0xcf   : > { %v114_v62 = vpop.trf.xlu0 }
  0xd0   : > { %1148 = vmatmul.mubr.msk.f32.gmra.mrb[12].mxu0 %vm117_vm2, %v114_v62 }
  0xd3   : > { %v115_v63 = vpop.trf.xlu0 }
  0xd4   : > { %1150 = vmatprep.mubr.msk.f32.mxu0 %vm117_vm2, %v115_v63 }
  0xd7   : > { %v116_v0 = vpop.trf.xlu0 }
  0xd8   : > { %1151 = vmatmul.mubr.msk.f32.gmra.mrb[14].mxu0 %vm117_vm2, %v116_v0 }
 0x173   : > { %v1131_v1 = vpop.f32.mrb[0].mxu0 }
 0x174   : > { %v232_v2 = vpop.f32.mrb[1].mxu0  ;;  %v312_v5 = vmax.f32 %v1131_v1, 1.0 }
 0x175   : > { %v311_v6 = vmax.f32 %v232_v2, 1.0 }
 0x176   : > { %1379 = vrcp.f32 %v312_v5 }
 0x177   : > { %1381 = vrcp.f32 %v311_v6  ;;  %v1511_v6 = vmov 0.0|0.0  }
 0x178   : > { %1249 = vmatprep.subr.bf16.mxu1 %v1511_v6 }
 0x17b   : > { %v1134_v3 = vpop.f32.mrb[2].mxu0 }
 0x17c   : > { %v242_v4 = vpop.f32.mrb[3].mxu0  ;;  %v314_v10 = vmax.f32 %v1134_v3, 1.0 }
 0x17d   : > { %v313_v9 = vmax.f32 %v242_v4, 1.0 }
 0x17f   : > { %1383 = vrcp.f32 %v313_v9 }
 0x180   : > { %1385 = vrcp.f32 %v314_v10  ;;  %v1637_v14 = vpop.eup %1379 }
 0x181   : > { %v1639_v16 = vpop.eup %1381 }
 0x182   : > { %v343_v20 = vadd.f32 %v1639_v16, %v1637_v14 }
 0x183   : > { %v1137_v7 = vpop.f32.mrb[4].mxu0 }
 0x184   : > { %v252_v8 = vpop.f32.mrb[5].mxu0  ;;  %v316_v15 = vmax.f32 %v1137_v7, 1.0 }
 0x185   : > { %v315_v11 = vmax.f32 %v252_v8, 1.0 }
 0x187   : > { %1387 = vrcp.f32 %v315_v11 }
 0x188   : > { %1389 = vrcp.f32 %v316_v15 }
 0x189   : > { %v1641_v18 = vpop.eup %1383 }
 0x18a   : > { %v344_v22 = vadd.f32 %v1641_v18, %v343_v20  ;;  %v1646_v25 = vpop.eup %1385  ;;  %v370_v20 = vld [vmem:[#allocation2 + $0x8] sm:$0xff] }
 0x18b   : > { %v1140_v12 = vpop.f32.mrb[6].mxu0 }
 0x18c   : > { %v262_v13 = vpop.f32.mrb[7].mxu0  ;;  %v318_v23 = vmax.f32 %v1140_v12, 1.0  ;;  %v345_v27 = vadd.f32 %v1646_v25, %v344_v22  ;;  %v1513_v12 = vmov 0.0   ;;  %v372_v22 = vld [vmem:[#allocation2 + $0x18] sm:$0xff] }
 0x18d   : > { %v317_v17 = vmax.f32 %v262_v13, 1.0  ;;  %1185 = vmatprep.mubr.msk.f32.mxu1 %vm1512_vm3, %v1513_v12 }
 0x18f   : > { %1391 = vrcp.f32 %v317_v17  ;;  %v369_v17 = vld [vmem:[#allocation2] sm:$0xff] }
 0x190   : > { %1393 = vrcp.f32 %v318_v23 }
 0x191   : > { %v1648_v26 = vpop.eup %1387 }
 0x192   : > { %v346_v31 = vadd.f32 %v1648_v26, %v345_v27  ;;  %v1652_v37 = vpop.eup %1389 }
 0x193   : > { %v1143_v19 = vpop.f32.mrb[8].mxu0 }
 0x194   : > { %v272_v21 = vpop.f32.mrb[9].mxu0  ;;  %v320_v29 = vmax.f32 %v1143_v19, 1.0  ;;  %v347_v39 = vadd.f32 %v1652_v37, %v346_v31 }
 0x195   : > { %v319_v24 = vmax.f32 %v272_v21, 1.0  ;;  %v371_v21 = vld [vmem:[#allocation2 + $0x10] sm:$0xff] }
 0x197   : > { %1395 = vrcp.f32 %v319_v24 }
 0x198   : > { %1397 = vrcp.f32 %v320_v29 }
 0x199   : > { %v1654_v38 = vpop.eup %1391 }
 0x19a   : > { %v348_v41 = vadd.f32 %v1654_v38, %v347_v39  ;;  %v1658_v43 = vpop.eup %1393 }
 0x19b   : > { %v1146_v28 = vpop.f32.mrb[10].mxu0 }
 0x19c   : > { %v282_v30 = vpop.f32.mrb[11].mxu0  ;;  %v322_v40 = vmax.f32 %v1146_v28, 1.0  ;;  %v349_v47 = vadd.f32 %v1658_v43, %v348_v41  ;;  %v373_v41 = vld [vmem:[#allocation2 + $0x20] sm:$0xff] }
 0x19d   : > { %v321_v34 = vmax.f32 %v282_v30, 1.0 }
 0x19f   : > { %1399 = vrcp.f32 %v321_v34 }
 0x1a0   : > { %1401 = vrcp.f32 %v322_v40 }
 0x1a1   : > { %v1660_v45 = vpop.eup %1395 }
 0x1a2   : > { %v350_v48 = vadd.f32 %v1660_v45, %v349_v47  ;;  %v1664_v50 = vpop.eup %1397 }
 0x1a3   : > { %v1149_v42 = vpop.f32.mrb[12].mxu0 }
 0x1a4   : > { %v292_v44 = vpop.f32.mrb[13].mxu0  ;;  %v324_v49 = vmax.f32 %v1149_v42, 1.0  ;;  %v351_v54 = vadd.f32 %v1664_v50, %v350_v48  ;;  %v374_v42 = vld [vmem:[#allocation2 + $0x28] sm:$0xff] }
 0x1a5   : > { %v323_v46 = vmax.f32 %v292_v44, 1.0 }
 0x1a7   : > { %1403 = vrcp.f32 %v323_v46 }
 0x1a8   : > { %1405 = vrcp.f32 %v324_v49 }
 0x1a9   : > { %v1666_v51 = vpop.eup %1399 }
 0x1aa   : > { %v352_v57 = vadd.f32 %v1666_v51, %v351_v54  ;;  %v1670_v58 = vpop.eup %1401 }
 0x1ab   : > { %v1152_v52 = vpop.f32.mrb[14].mxu0 }
 0x1ac   : > { %v302_v53 = vpop.f32.mrb[15].mxu0  ;;  %v326_v55 = vmax.f32 %v1152_v52, 1.0  ;;  %v353_v60 = vadd.f32 %v1670_v58, %v352_v57  ;;  %v376_v57 = vld [vmem:[#allocation2 + $0x38] sm:$0xff] }
 0x1ad   : > { %v325_v56 = vmax.f32 %v302_v53, 1.0 }
 0x1af   : > { %1407 = vrcp.f32 %v325_v56  ;;  %v375_v56 = vld [vmem:[#allocation2 + $0x30] sm:$0xff] }
 0x1b0   : > { %1409 = vrcp.f32 %v326_v55 }
 0x1b1   : > { %v1672_v59 = vpop.eup %1403 }
 0x1b2   : > { %v354_v61 = vadd.f32 %v1672_v59, %v353_v60  ;;  %v1676_v62 = vpop.eup %1405 }
 0x1b4   : > { %v355_v63 = vadd.f32 %v1676_v62, %v354_v61 }
 0x1b9   : > { %v1679_v0 = vpop.eup %1407 }
 0x1ba   : > { %v356_v1 = vadd.f32 %v1679_v0, %v355_v63  ;;  %v1682_v2 = vpop.eup %1409 }
 0x1bc   : > { %v357_v3 = vadd.f32 %v1682_v2, %v356_v1 }
 0x1be   : > { %358 = vadd.xlane.f32.xlu0 %v357_v3  ;;  %v377_v3 = vld [vmem:[#allocation2 + $0x40] sm:$0xff] }
 0x24b   : > { %v359_v4 = vpop.xlane.xlu0 %358 }
 0x24c   : > { %v360_v5 = vrot.slane %v359_v4, 4 }
 0x24e   : > { %v361_v7 = vadd.f32 %v360_v5, %v359_v4 }
 0x250   : > { %v362_v8 = vrot.slane %v361_v7, 2 }
 0x252   : > { %v363_v9 = vadd.f32 %v362_v8, %v361_v7 }
 0x254   : > { %v364_v10 = vrot.slane %v363_v9, 1 }
 0x256   : > { %v365_v11 = vadd.f32 %v364_v10, %v363_v9  ;;  %v379_v10 = vld [vmem:[#allocation2 + $0x50] sm:$0xff] }
 0x258   : > { %1297 = vpush %v365_v11  ;;  %v380_v11 = vld [vmem:[#allocation2 + $0x58] sm:$0xff] }
 0x289   : > { %s1298_s1 = spop %1297 }
 0x28a   : > { %s1040_s16 = sadd.f32 -128.0, %s1298_s1 }
 0x28c   : > { %s368_s18 = smax.f32 %s1514_s17, %s1040_s16 }
 0x28d   : > { %v385_v13 = vstv %s368_s18 }
 0x28e   : > { %1411 = vrcp.f32 %v385_v13 }
 0x298   : > { %v1412_v15 = vpop.eup %1411 }
 0x299   : > { %1299 = vpush %v1412_v15 }
 0x2ca   : > { %s1300_s19 = spop %1299 }
 0x2cb   : > { %v1686_v19 = vstv %s1300_s19 }
 0x2cc   : > { %v389_v23 = vmul.f32 %v1639_v16, %v1686_v19  ;;  %v390_v24 = vmul.f32 %v1637_v14, %v1686_v19  ;;  %v391_v27 = vmul.f32 %v1641_v18, %v1686_v19  ;;  %v392_v28 = vmul.f32 %v1646_v25, %v1686_v19 }
 0x2cd   : > { %v393_v29 = vmul.f32 %v1648_v26, %v1686_v19  ;;  %v394_v30 = vmul.f32 %v1652_v37, %v1686_v19  ;;  %v395_v49 = vmul.f32 %v1654_v38, %v1686_v19  ;;  %v396_v52 = vmul.f32 %v1658_v43, %v1686_v19 }
 0x2ce   : > { %v405_v31 = vsub.f32 %v369_v17, %v389_v23  ;;  %v406_v34 = vsub.f32 %v370_v20, %v390_v24  ;;  %v407_v39 = vsub.f32 %v371_v21, %v391_v27  ;;  %v408_v40 = vsub.f32 %v372_v22, %v392_v28  ;;  %v381_v21 = vld [vmem:[#allocation2 + $0x60] sm:$0xff]  ;;  %v382_v22 = vld [vmem:[#allocation2 + $0x68] sm:$0xff] }
 0x2cf   : > { %v409_v47 = vsub.f32 %v373_v41, %v393_v29  ;;  %v410_v48 = vsub.f32 %v374_v42, %v394_v30  ;;  %v411_v60 = vsub.f32 %v375_v56, %v395_v49  ;;  %v412_v61 = vsub.f32 %v376_v57, %v396_v52  ;;  %v383_v30 = vld [vmem:[#allocation2 + $0x70] sm:$0xff] }
 0x2d0   : > { %v421_v44 = vmul.f32 %v1639_v16, %v405_v31  ;;  %v422_v46 = vmul.f32 %v1637_v14, %v406_v34  ;;  %v423_v54 = vmul.f32 %v1641_v18, %v407_v39  ;;  %v424_v55 = vmul.f32 %v1646_v25, %v408_v40  ;;  %v378_v25 = vld [vmem:[#allocation2 + $0x48] sm:$0xff]  ;;  %v384_v31 = vld [vmem:[#allocation2 + $0x78] sm:$0xff] }
 0x2d1   : > { %v425_v14 = vmul.f32 %v1648_v26, %v409_v47  ;;  %v426_v16 = vmul.f32 %v1652_v37, %v410_v48  ;;  %v397_v1 = vmul.f32 %v1660_v45, %v1686_v19  ;;  %v398_v18 = vmul.f32 %v1664_v50, %v1686_v19 }
 0x2d2   : > { %v1250_v53 = vpack.c.bf16 %v422_v46, %v421_v44  ;;  %v1253_v63 = vpack.c.bf16 %v424_v55, %v423_v54  ;;  %v427_v5 = vmul.f32 %v1654_v38, %v411_v60  ;;  %v428_v26 = vmul.f32 %v1658_v43, %v412_v61 }
 0x2d3   : > { %v1256_v4 = vpack.c.bf16 %v426_v16, %v425_v14  ;;  %v413_v37 = vsub.f32 %v377_v3, %v397_v1  ;;  %v414_v7 = vsub.f32 %v378_v25, %v398_v18  ;;  %v399_v8 = vmul.f32 %v1666_v51, %v1686_v19 }
 0x2d4   : > { %1251 = vmatpush3.bf16.msra.mxu1 %v1250_v53  ;;  %v400_v9 = vmul.f32 %v1670_v58, %v1686_v19  ;;  %v1259_v12 = vpack.c.bf16 %v428_v26, %v427_v5  ;;  %v401_v13 = vmul.f32 %v1672_v59, %v1686_v19  ;;  %v402_v38 = vmul.f32 %v1676_v62, %v1686_v19 }
 0x2d5   : > { %1252 = vmatprep.subr.bf16.mxu1 %v1511_v6  ;;  %v429_v43 = vmul.f32 %v1660_v45, %v413_v37  ;;  %v430_v15 = vmul.f32 %v1664_v50, %v414_v7  ;;  %v415_v17 = vsub.f32 %v379_v10, %v399_v8  ;;  %v403_v24 = vmul.f32 %v1679_v0, %v1686_v19 }
 0x2d6   : > { %v416_v20 = vsub.f32 %v380_v11, %v400_v9  ;;  %v417_v23 = vsub.f32 %v381_v21, %v401_v13  ;;  %v404_v27 = vmul.f32 %v1682_v2, %v1686_v19  ;;  %v418_v50 = vsub.f32 %v382_v22, %v402_v38 }
 0x2d7   : > { %v1262_v28 = vpack.c.bf16 %v430_v15, %v429_v43  ;;  %v431_v29 = vmul.f32 %v1666_v51, %v415_v17  ;;  %v419_v34 = vsub.f32 %v383_v30, %v403_v24  ;;  %v521_v53 = vmul.f32 0.5, %v1485_v36 }
 0x2d8   : > { %1254 = vmatpush3.bf16.msra.mxu1 %v1253_v63  ;;  %v432_v45 = vmul.f32 %v1670_v58, %v416_v20  ;;  %v433_v40 = vmul.f32 %v1672_v59, %v417_v23  ;;  %v434_v41 = vmul.f32 %v1676_v62, %v418_v50  ;;  %v420_v42 = vsub.f32 %v384_v31, %v404_v27 }
 0x2d9   : > { %1255 = vmatprep.subr.bf16.mxu1 %v1511_v6  ;;  %v435_v51 = vmul.f32 %v1679_v0, %v419_v34  ;;  %v509_v59 = vsub.s32 2, %v1584_v32  ;;  %v517_v0 = vmul.f32 0.8, %v1481_v35 }
 0x2da   : > { %v1265_v39 = vpack.c.bf16 %v432_v45, %v431_v29  ;;  %v1268_v19 = vpack.c.bf16 %v434_v41, %v433_v40  ;;  %v436_v58 = vmul.f32 %v1682_v2, %v420_v42  ;;  %v518_v2 = vadd.f32 0.2, %v1481_v35 }
 0x2dc   : > { %1257 = vmatpush3.bf16.msra.mxu1 %v1256_v4  ;;  %v1271_v44 = vpack.c.bf16 %v436_v58, %v435_v51 }
 0x2dd   : > { %1258 = vmatprep.subr.bf16.mxu1 %v1511_v6 }
 0x2e0   : > { %1260 = vmatpush3.bf16.msra.mxu1 %v1259_v12 }
 0x2e1   : > { %1261 = vmatprep.subr.bf16.mxu1 %v1511_v6 }
 0x2e4   : > { %1263 = vmatpush3.bf16.msra.mxu1 %v1262_v28 }
 0x2e5   : > { %1264 = vmatprep.subr.bf16.mxu1 %v1511_v6 }
 0x2e8   : > { %1266 = vmatpush3.bf16.msra.mxu1 %v1265_v39 }
 0x2e9   : > { %1267 = vmatprep.subr.bf16.mxu1 %v1511_v6 }
 0x2ec   : > { %1269 = vmatpush3.bf16.msra.mxu1 %v1268_v19 }
 0x2ed   : > { %1270 = vmatprep.subr.bf16.mxu1 %v1511_v6 }
 0x2f0   : > { %1272 = vmatpush3.bf16.msra.mxu1 %v1271_v44 }
 0x2f3   : > { %1186 = vmatmul.mubr.f32.vlgmr.msra.gmra.mrb[0].mxu1 %v1489_v33 }
 0x3c6   : > { %v503_v46 = vpop.f32.mrb[0].mxu1 }
 0x3c7   : > { %v510_v62 = vrot.slane %v503_v46, %v509_v59  ;;  %v1187_v47 = vpop.f32.mrb[1].mxu1 }
 0x3c9   : > { %v511_v48 = vmul.f32 %v1489_v33, %v510_v62 }
 0x3cb   : > { %v512_v49 = vsub.f32 %v511_v48, %v503_v46 }
 0x3cd   : > { %vm513_vm5 = vcmp.gt.f32.partialorder %v512_v49, 0.0 }
 0x3ce   : > { %vm515_vm6 = vmxor %vm513_vm5, %vm514_vm4 }
 0x3cf   : > { %vm516_vm8 = vmxor %vm515_vm6, %vm1515_vm7 }
 0x3d0   : > { %v519_v6 = vsel %vm516_vm8, %v517_v0, %v518_v2 }
 0x3d1   : > { %v520_v52 = vmax.f32 %v519_v6, 0.01  }
 0x3d3   : > { %v522_v54 = vmul.f32 800.0, %v520_v52  ;;  %v1986_v35 = vmov %v520_v52 }
 0x3d5   : > { %v523_v55 = vmul.f32 %v522_v54, %v512_v49  ;;  %66 = sbr.rel (!%p64_p0) target bundleno = 12 (0xc), region = 42 }
 0x3d7   : > { %v524_v56 = vsub.f32 %v521_v53, %v523_v55  }
 0x3d9   : > { %v525_v57 = vadd.f32 %v1489_v33, %v524_v56   ;;  %v1987_v36 = vmov %v524_v56 }
 0x3db   : > { %v1988_v33 = vmov %v525_v57 }
 0x3dc LB: > { %v535_v33 = vmul.f32 %v1505_v57, %v1505_v57  ;;  %v546_v1 = vmul.f32 -2.0, %v1505_v57  ;;  %vm1517_vm9 = vmmov 0   ;;  %s1519_s23 = smov 1e-06   ;;  %vm978_vm10 = vcmp.gt.f32.partialorder %v1501_v56, 0.0  ;;  %s531_s20 = sadd.s32 1, %s1509_s20   ;;  %s1509_s20 = sphi %s1768_s20, %s531_s20   ;;  %v1505_v57 = vphi %v525_v57, %v1989_v57   ;;  %v1501_v56 = vphi %v524_v56, %v988_v56   ;;  %v1497_v52 = vphi %v520_v52, %v984_v52  }
 0x3dd   : > { %vm1520_vm13 = vmmov 1   ;;  %p528_p1 = scmp.ge.s32.totalorder %s531_s20, 750  }
 0x3de   : > { %v536_v35 = vrot.slane %v535_v33, 4  ;;  %v547_v3 = vsel %vm78_vm0, 1.0, %v546_v1 }
 0x3e0   : > { %v537_v36 = vadd.f32 %v536_v35, %v535_v33 }
 0x3e2   : > { %v538_v14 = vrot.slane %v537_v36, 2 }
 0x3e4   : > { %v539_v16 = vadd.f32 %v538_v14, %v537_v36 }
 0x3e6   : > { %v540_v60 = vrot.slane %v539_v16, 1 }
 0x3e8   : > { %v541_v61 = vadd.f32 %v540_v60, %v539_v16 }
 0x3ea   : > { %v543_v63 = vsel %vm78_vm0, %v541_v61, %v1505_v57  ;;  %v1041_v18 = vadd.f32 -1.0, %v541_v61 }
 0x3eb   : > { %549 = vxpose.xlu0.b32.start.end [1/1] (short) %v543_v63, 128 }
 0x3ec   : > { %v548_v25 = vsel %vm80_vm1, %v1041_v18, %v547_v3 }
 0x3ed   : > { %1188 = vmatprep.subr.mxu0 %v548_v25 }
 0x3ee   : > { %1189 = vmatpush3.msra.mxu0 %v548_v25 }
 0x46b   : > { %v565_v4 = vpop.trf.xlu0 }
 0x46c   : > { %1190 = vmatprep.mubr.msk.f32.mxu0 %vm117_vm2, %v565_v4 }
 0x46f   : > { %v566_v5 = vpop.trf.xlu0 }
 0x470   : > { %1191 = vmatmul.mubr.msk.f32.vlgmr.msra.gmra.mrb[0].mxu0 %vm117_vm2, %v566_v5 }
 0x473   : > { %v567_v26 = vpop.trf.xlu0 }
 0x474   : > { %1193 = vmatprep.mubr.msk.f32.mxu0 %vm117_vm2, %v567_v26 }
 0x477   : > { %v568_v37 = vpop.trf.xlu0 }
 0x478   : > { %1194 = vmatmul.mubr.msk.f32.gmra.mrb[2].mxu0 %vm117_vm2, %v568_v37 }
 0x47b   : > { %v569_v7 = vpop.trf.xlu0 }
 0x47c   : > { %1196 = vmatprep.mubr.msk.f32.mxu0 %vm117_vm2, %v569_v7 }
 0x47f   : > { %v570_v8 = vpop.trf.xlu0 }
 0x480   : > { %1197 = vmatmul.mubr.msk.f32.gmra.mrb[4].mxu0 %vm117_vm2, %v570_v8 }
 0x483   : > { %v571_v9 = vpop.trf.xlu0 }
 0x484   : > { %1199 = vmatprep.mubr.msk.f32.mxu0 %vm117_vm2, %v571_v9 }
 0x487   : > { %v572_v10 = vpop.trf.xlu0 }
 0x488   : > { %1200 = vmatmul.mubr.msk.f32.gmra.mrb[6].mxu0 %vm117_vm2, %v572_v10 }
 0x48b   : > { %v573_v11 = vpop.trf.xlu0 }
 0x48c   : > { %1202 = vmatprep.mubr.msk.f32.mxu0 %vm117_vm2, %v573_v11 }
 0x48f   : > { %v574_v12 = vpop.trf.xlu0 }
 0x490   : > { %1203 = vmatmul.mubr.msk.f32.gmra.mrb[8].mxu0 %vm117_vm2, %v574_v12 }
 0x493   : > { %v575_v13 = vpop.trf.xlu0 }
 0x494   : > { %1205 = vmatprep.mubr.msk.f32.mxu0 %vm117_vm2, %v575_v13 }
 0x497   : > { %v576_v38 = vpop.trf.xlu0 }
 0x498   : > { %1206 = vmatmul.mubr.msk.f32.gmra.mrb[10].mxu0 %vm117_vm2, %v576_v38 }
 0x49b   : > { %v577_v43 = vpop.trf.xlu0 }
 0x49c   : > { %1208 = vmatprep.mubr.msk.f32.mxu0 %vm117_vm2, %v577_v43 }
 0x49f   : > { %v578_v15 = vpop.trf.xlu0 }
 0x4a0   : > { %1209 = vmatmul.mubr.msk.f32.gmra.mrb[12].mxu0 %vm117_vm2, %v578_v15 }
 0x4a3   : > { %v579_v17 = vpop.trf.xlu0 }
 0x4a4   : > { %1211 = vmatprep.mubr.msk.f32.mxu0 %vm117_vm2, %v579_v17 }
 0x4a7   : > { %v580_v20 = vpop.trf.xlu0 }
 0x4a8   : > { %1212 = vmatmul.mubr.msk.f32.gmra.mrb[14].mxu0 %vm117_vm2, %v580_v20 }
 0x543   : > { %v1192_v21 = vpop.f32.mrb[0].mxu0 }
 0x544   : > { %v696_v22 = vpop.f32.mrb[1].mxu0  ;;  %v776_v27 = vmax.f32 %v1192_v21, 1.0 }
 0x545   : > { %v775_v28 = vmax.f32 %v696_v22, 1.0 }
 0x546   : > { %1413 = vrcp.f32 %v776_v27 }
 0x547   : > { %1415 = vrcp.f32 %v775_v28 }
 0x54b   : > { %v1195_v23 = vpop.f32.mrb[2].mxu0 }
 0x54c   : > { %v706_v24 = vpop.f32.mrb[3].mxu0  ;;  %v778_v30 = vmax.f32 %v1195_v23, 1.0 }
 0x54d   : > { %v777_v50 = vmax.f32 %v706_v24, 1.0 }
 0x54f   : > { %1417 = vrcp.f32 %v777_v50 }
 0x550   : > { %1419 = vrcp.f32 %v778_v30  ;;  %v1808_v40 = vpop.eup %1413 }
 0x551   : > { %v1810_v42 = vpop.eup %1415 }
 0x552   : > { %v807_v44 = vadd.f32 %v1810_v42, %v1808_v40 }
 0x553   : > { %v1198_v29 = vpop.f32.mrb[4].mxu0 }
 0x554   : > { %v716_v45 = vpop.f32.mrb[5].mxu0  ;;  %v780_v41 = vmax.f32 %v1198_v29, 1.0  ;;  %v1516_v29 = vmov 0.0|0.0  }
 0x555   : > { %v779_v31 = vmax.f32 %v716_v45, 1.0  ;;  %1273 = vmatprep.subr.bf16.mxu1 %v1516_v29 }
 0x557   : > { %1421 = vrcp.f32 %v779_v31 }
 0x558   : > { %1423 = vrcp.f32 %v780_v41 }
 0x559   : > { %v1812_v51 = vpop.eup %1417 }
 0x55a   : > { %v808_v62 = vadd.f32 %v1812_v51, %v807_v44  ;;  %v1817_v49 = vpop.eup %1419 }
 0x55b   : > { %v1201_v34 = vpop.f32.mrb[6].mxu0 }
 0x55c   : > { %v726_v39 = vpop.f32.mrb[7].mxu0  ;;  %v782_v47 = vmax.f32 %v1201_v34, 1.0  ;;  %v809_v2 = vadd.f32 %v1817_v49, %v808_v62  ;;  %v835_v62 = vld [vmem:[%s1983_s0 + $0x10] sm:$0xff] }
 0x55d   : > { %v781_v19 = vmax.f32 %v726_v39, 1.0  ;;  %v1518_v39 = vmov 0.0  }
 0x55e   : > { %1246 = vmatprep.mubr.msk.f32.mxu1 %vm1517_vm9, %v1518_v39  ;;  %v844_v39 = vld [vmem:[%s1983_s0 + $0x58] sm:$0xff] }
 0x55f   : > { %1425 = vrcp.f32 %v781_v19 }
 0x560   : > { %1427 = vrcp.f32 %v782_v47  ;;  %v836_v47 = vld [vmem:[%s1983_s0 + $0x18] sm:$0xff] }
 0x561   : > { %v1819_v0 = vpop.eup %1421 }
 0x562   : > { %v810_v55 = vadd.f32 %v1819_v0, %v809_v2  ;;  %v1823_v35 = vpop.eup %1423 }
 0x563   : > { %v1204_v58 = vpop.f32.mrb[8].mxu0 }
 0x564   : > { %v736_v46 = vpop.f32.mrb[9].mxu0  ;;  %v784_v53 = vmax.f32 %v1204_v58, 1.0  ;;  %v811_v14 = vadd.f32 %v1823_v35, %v810_v55  ;;  %v833_v58 = vld [vmem:[%s1983_s0] sm:$0xff] }
 0x565   : > { %v783_v48 = vmax.f32 %v736_v46, 1.0  ;;  %v834_v46 = vld [vmem:[%s1983_s0 + $0x8] sm:$0xff] }
 0x567   : > { %1429 = vrcp.f32 %v783_v48 }
 0x568   : > { %1431 = vrcp.f32 %v784_v53 }
 0x569   : > { %v1825_v36 = vpop.eup %1425 }
 0x56a   : > { %v812_v60 = vadd.f32 %v1825_v36, %v811_v14  ;;  %v1829_v63 = vpop.eup %1427 }
 0x56b   : > { %v1207_v6 = vpop.f32.mrb[10].mxu0 }
 0x56c   : > { %v746_v54 = vpop.f32.mrb[11].mxu0  ;;  %v786_v16 = vmax.f32 %v1207_v6, 1.0  ;;  %v813_v25 = vadd.f32 %v1829_v63, %v812_v60 }
 0x56d   : > { %v785_v33 = vmax.f32 %v746_v54, 1.0 }
 0x56f   : > { %1433 = vrcp.f32 %v785_v33 }
 0x570   : > { %1435 = vrcp.f32 %v786_v16 }
 0x571   : > { %v1831_v18 = vpop.eup %1429 }
 0x572   : > { %v814_v4 = vadd.f32 %v1831_v18, %v813_v25  ;;  %v1835_v26 = vpop.eup %1431 }
 0x573   : > { %v1210_v61 = vpop.f32.mrb[12].mxu0 }
 0x574   : > { %v756_v1 = vpop.f32.mrb[13].mxu0  ;;  %v788_v5 = vmax.f32 %v1210_v61, 1.0  ;;  %v815_v9 = vadd.f32 %v1835_v26, %v814_v4  ;;  %v837_v61 = vld [vmem:[%s1983_s0 + $0x20] sm:$0xff] }
 0x575   : > { %v787_v3 = vmax.f32 %v756_v1, 1.0  ;;  %v838_v1 = vld [vmem:[%s1983_s0 + $0x28] sm:$0xff] }
 0x577   : > { %1437 = vrcp.f32 %v787_v3 }
 0x578   : > { %1439 = vrcp.f32 %v788_v5 }
 0x579   : > { %v1837_v37 = vpop.eup %1433 }
 0x57a   : > { %v816_v12 = vadd.f32 %v1837_v37, %v815_v9  ;;  %v1841_v13 = vpop.eup %1435 }
 0x57b   : > { %v1213_v7 = vpop.f32.mrb[14].mxu0 }
 0x57c   : > { %v766_v8 = vpop.f32.mrb[15].mxu0  ;;  %v790_v10 = vmax.f32 %v1213_v7, 1.0  ;;  %v817_v43 = vadd.f32 %v1841_v13, %v816_v12  ;;  %v839_v12 = vld [vmem:[%s1983_s0 + $0x30] sm:$0xff] }
 0x57d   : > { %v789_v11 = vmax.f32 %v766_v8, 1.0 }
 0x57f   : > { %1441 = vrcp.f32 %v789_v11 }
 0x580   : > { %1443 = vrcp.f32 %v790_v10 }
 0x581   : > { %v1843_v38 = vpop.eup %1437 }
 0x582   : > { %v818_v15 = vadd.f32 %v1843_v38, %v817_v43  ;;  %v1847_v17 = vpop.eup %1439 }
 0x584   : > { %v819_v20 = vadd.f32 %v1847_v17, %v818_v15 }
 0x589   : > { %v1850_v21 = vpop.eup %1441 }
 0x58a   : > { %v820_v22 = vadd.f32 %v1850_v21, %v819_v20  ;;  %v1853_v23 = vpop.eup %1443 }
 0x58c   : > { %v821_v24 = vadd.f32 %v1853_v23, %v820_v22 }
 0x58e   : > { %822 = vadd.xlane.f32.xlu0 %v821_v24  ;;  %v841_v24 = vld [vmem:[%s1983_s0 + $0x40] sm:$0xff] }
 0x61b   : > { %v823_v27 = vpop.xlane.xlu0 %822 }
 0x61c   : > { %v824_v28 = vrot.slane %v823_v27, 4 }
 0x61e   : > { %v825_v45 = vadd.f32 %v824_v28, %v823_v27  ;;  %v842_v27 = vld [vmem:[%s1983_s0 + $0x48] sm:$0xff] }
 0x620   : > { %v826_v50 = vrot.slane %v825_v45, 2 }
 0x622   : > { %v827_v30 = vadd.f32 %v826_v50, %v825_v45 }
 0x624   : > { %v828_v31 = vrot.slane %v827_v30, 1 }
 0x626   : > { %v829_v34 = vadd.f32 %v828_v31, %v827_v30 }
 0x628   : > { %1301 = vpush %v829_v34  ;;  %v843_v34 = vld [vmem:[%s1983_s0 + $0x50] sm:$0xff] }
 0x659   : > { %s1302_s21 = spop %1301 }
 0x65a   : > { %s1058_s22 = sadd.f32 -128.0, %s1302_s21 }
 0x65c   : > { %s832_s24 = smax.f32 %s1519_s23, %s1058_s22 }
 0x65d   : > { %v849_v41 = vstv %s832_s24 }
 0x65e   : > { %1445 = vrcp.f32 %v849_v41 }
 0x668   : > { %v1446_v19 = vpop.eup %1445 }
 0x669   : > { %1303 = vpush %v1446_v19 }
 0x69a   : > { %s1304_s25 = spop %1303 }
 0x69b   : > { %v1860_v44 = vstv %s1304_s25 }
 0x69c   : > { %v853_v48 = vmul.f32 %v1810_v42, %v1860_v44  ;;  %v854_v2 = vmul.f32 %v1808_v40, %v1860_v44  ;;  %v855_v6 = vmul.f32 %v1812_v51, %v1860_v44  ;;  %v856_v53 = vmul.f32 %v1817_v49, %v1860_v44 }
 0x69d   : > { %v857_v54 = vmul.f32 %v1819_v0, %v1860_v44  ;;  %v858_v55 = vmul.f32 %v1823_v35, %v1860_v44  ;;  %v859_v7 = vmul.f32 %v1825_v36, %v1860_v44  ;;  %v860_v8 = vmul.f32 %v1829_v63, %v1860_v44 }
 0x69e   : > { %v869_v33 = vsub.f32 %v833_v58, %v853_v48  ;;  %v870_v14 = vsub.f32 %v834_v46, %v854_v2  ;;  %v871_v16 = vsub.f32 %v835_v62, %v855_v6  ;;  %v872_v60 = vsub.f32 %v836_v47, %v856_v53  ;;  %v845_v47 = vld [vmem:[%s1983_s0 + $0x60] sm:$0xff]  ;;  %v846_v48 = vld [vmem:[%s1983_s0 + $0x68] sm:$0xff] }
 0x69f   : > { %v873_v4 = vsub.f32 %v837_v61, %v857_v54  ;;  %v874_v5 = vsub.f32 %v838_v1, %v858_v55  ;;  %v875_v15 = vsub.f32 %v839_v12, %v859_v7  ;;  %v862_v22 = vmul.f32 %v1835_v26, %v1860_v44 }
 0x6a0   : > { %v885_v3 = vmul.f32 %v1810_v42, %v869_v33  ;;  %v886_v25 = vmul.f32 %v1808_v40, %v870_v14  ;;  %v887_v10 = vmul.f32 %v1812_v51, %v871_v16  ;;  %v888_v11 = vmul.f32 %v1817_v49, %v872_v60  ;;  %v840_v40 = vld [vmem:[%s1983_s0 + $0x38] sm:$0xff]  ;;  %v847_v33 = vld [vmem:[%s1983_s0 + $0x70] sm:$0xff] }
 0x6a1   : > { %v889_v42 = vmul.f32 %v1819_v0, %v873_v4  ;;  %v890_v43 = vmul.f32 %v1823_v35, %v874_v5  ;;  %v876_v20 = vsub.f32 %v840_v40, %v860_v8  ;;  %v861_v49 = vmul.f32 %v1831_v18, %v1860_v44  ;;  %v848_v14 = vld [vmem:[%s1983_s0 + $0x78] sm:$0xff] }
 0x6a2   : > { %v1274_v9 = vpack.c.bf16 %v886_v25, %v885_v3  ;;  %v1277_v51 = vpack.c.bf16 %v888_v11, %v887_v10  ;;  %v891_v35 = vmul.f32 %v1825_v36, %v875_v15  ;;  %v878_v50 = vsub.f32 %v842_v27, %v862_v22 }
 0x6a3   : > { %v1280_v0 = vpack.c.bf16 %v890_v43, %v889_v42  ;;  %v892_v28 = vmul.f32 %v1829_v63, %v876_v20  ;;  %v877_v45 = vsub.f32 %v841_v24, %v861_v49  ;;  %v863_v30 = vmul.f32 %v1837_v37, %v1860_v44 }
 0x6a4   : > { %1275 = vmatpush3.bf16.msra.mxu1 %v1274_v9  ;;  %v864_v31 = vmul.f32 %v1841_v13, %v1860_v44  ;;  %v865_v63 = vmul.f32 %v1843_v38, %v1860_v44  ;;  %v866_v41 = vmul.f32 %v1847_v17, %v1860_v44  ;;  %v894_v58 = vmul.f32 %v1835_v26, %v878_v50 }
 0x6a5   : > { %1276 = vmatprep.subr.bf16.mxu1 %v1516_v29  ;;  %v1283_v36 = vpack.c.bf16 %v892_v28, %v891_v35  ;;  %v893_v19 = vmul.f32 %v1831_v18, %v877_v45  ;;  %v879_v46 = vsub.f32 %v843_v34, %v863_v30  ;;  %v867_v6 = vmul.f32 %v1850_v21, %v1860_v44 }
 0x6a6   : > { %v880_v62 = vsub.f32 %v844_v39, %v864_v31  ;;  %v881_v2 = vsub.f32 %v845_v47, %v865_v63  ;;  %v868_v18 = vmul.f32 %v1853_v23, %v1860_v44  ;;  %v882_v55 = vsub.f32 %v846_v48, %v866_v41 }
 0x6a7   : > { %v1286_v26 = vpack.c.bf16 %v894_v58, %v893_v19  ;;  %v895_v53 = vmul.f32 %v1837_v37, %v879_v46  ;;  %v883_v16 = vsub.f32 %v847_v33, %v867_v6  ;;  %v985_v8 = vmul.f32 0.8, %v1501_v56 }
 0x6a8   : > { %1278 = vmatpush3.bf16.msra.mxu1 %v1277_v51  ;;  %v896_v54 = vmul.f32 %v1841_v13, %v880_v62  ;;  %v897_v44 = vmul.f32 %v1843_v38, %v881_v2  ;;  %v898_v37 = vmul.f32 %v1847_v17, %v882_v55  ;;  %v884_v61 = vsub.f32 %v848_v14, %v868_v18 }
 0x6a9   : > { %1279 = vmatprep.subr.bf16.mxu1 %v1516_v29  ;;  %v899_v1 = vmul.f32 %v1850_v21, %v883_v16  ;;  %v981_v21 = vmul.f32 0.8, %v1497_v52 }
 0x6aa   : > { %v1289_v60 = vpack.c.bf16 %v896_v54, %v895_v53  ;;  %v1292_v13 = vpack.c.bf16 %v898_v37, %v897_v44  ;;  %v900_v3 = vmul.f32 %v1853_v23, %v884_v61  ;;  %v982_v23 = vadd.f32 0.2, %v1497_v52 }
 0x6ac   : > { %1281 = vmatpush3.bf16.msra.mxu1 %v1280_v0  ;;  %v1295_v25 = vpack.c.bf16 %v900_v3, %v899_v1 }
 0x6ad   : > { %1282 = vmatprep.subr.bf16.mxu1 %v1516_v29 }
 0x6b0   : > { %1284 = vmatpush3.bf16.msra.mxu1 %v1283_v36 }
 0x6b1   : > { %1285 = vmatprep.subr.bf16.mxu1 %v1516_v29 }
 0x6b4   : > { %1287 = vmatpush3.bf16.msra.mxu1 %v1286_v26 }
 0x6b5   : > { %1288 = vmatprep.subr.bf16.mxu1 %v1516_v29 }
 0x6b8   : > { %1290 = vmatpush3.bf16.msra.mxu1 %v1289_v60 }
 0x6b9   : > { %1291 = vmatprep.subr.bf16.mxu1 %v1516_v29 }
 0x6bc   : > { %1293 = vmatpush3.bf16.msra.mxu1 %v1292_v13 }
 0x6bd   : > { %1294 = vmatprep.subr.bf16.mxu1 %v1516_v29 }
 0x6c0   : > { %1296 = vmatpush3.bf16.msra.mxu1 %v1295_v25 }
 0x6c3   : > { %1247 = vmatmul.mubr.f32.vlgmr.msra.gmra.mrb[0].mxu1 %v1505_v57 }
 0x796   : > { %v967_v4 = vpop.f32.mrb[0].mxu1 }
 0x797   : > { %v974_v38 = vrot.slane %v967_v4, %v509_v59  ;;  %v1248_v17 = vpop.f32.mrb[1].mxu1 }
 0x799   : > { %v975_v5 = vmul.f32 %v1505_v57, %v974_v38 }
 0x79b   : > { %v976_v7 = vsub.f32 %v975_v5, %v967_v4 }
 0x79d   : > { %vm977_vm11 = vcmp.gt.f32.partialorder %v976_v7, 0.0 }
 0x79e   : > { %vm979_vm12 = vmxor %vm977_vm11, %vm978_vm10 }
 0x79f   : > { %vm980_vm14 = vmxor %vm979_vm12, %vm1520_vm13 }
 0x7a0   : > { %v983_v29 = vsel %vm980_vm14, %v981_v21, %v982_v23 }
 0x7a1   : > { %v984_v52 = vmax.f32 %v983_v29, 0.01  }
 0x7a3   : > { %v986_v9 = vmul.f32 800.0, %v984_v52 }
 0x7a5   : > { %v987_v10 = vmul.f32 %v986_v9, %v976_v7  ;;  %530 = sbr.rel (!%p528_p1) target bundleno = 988 (0x3dc), region = 53 }
 0x7a7   : > { %v988_v56 = vsub.f32 %v985_v8, %v987_v10  }
 0x7a9   : > { %v989_v11 = vadd.f32 %v1505_v57, %v988_v56  }
 0x7ab   : > { %v1989_v57 = vmov %v989_v11  ;;  %990 = vst [vmem:[%s1984_s2] sm:$0xff] (%p528_p1), %v989_v11 }

</bundles_post_ra>
